<compile_context>
chip_gen: v6e
topology: v6e:2x2x1
jax: 0.10.0
libtpu: 0.0.40
codegen_flags: <defaults>
</compile_context>

<pallas_src>
import jax
import jax.numpy as jnp
from jax.experimental import pallas as pl
from jax.experimental.pallas import tpu as pltpu


def _round_up(n, m):
    return ((n + m - 1) // m) * m


def _pad_to(a, shape):
    pads = [(0, s - d) for d, s in zip(a.shape, shape)]
    if all(p == (0, 0) for p in pads):
        return a
    return jnp.pad(a, pads)


def _residual_mlp_kernel(x_ref, win_ref, bin_ref,
                         w1_ref, b1_ref, w2_ref, b2_ref,
                         wout_ref, bout_ref, o_ref, h_ref):
    l = pl.program_id(1)

    # ---- input layer + ReLU (first layer-step of this batch tile) ----
    @pl.when(l == 0)
    def _():
        h = jnp.dot(x_ref[...], win_ref[...],
                    preferred_element_type=jnp.float32)
        h = h + bin_ref[...]
        h_ref[...] = jnp.maximum(h, 0.0)

    # ---- residual block l: fc1 -> ReLU -> fc2 -> + res (Dropout = identity) ----
    res = h_ref[...]                                     # f32 carry
    t = jnp.dot(res.astype(w1_ref.dtype), w1_ref[0],
                preferred_element_type=jnp.float32) + b1_ref[0]
    t = jnp.maximum(t, 0.0)
    t = jnp.dot(t.astype(w2_ref.dtype), w2_ref[0],
                preferred_element_type=jnp.float32) + b2_ref[0]
    h_ref[...] = t + res

    # ---- output layer (no activation) after the last residual block ----
    @pl.when(l == pl.num_programs(1) - 1)
    def _():
        out = jnp.dot(h_ref[...].astype(wout_ref.dtype), wout_ref[...],
                      preferred_element_type=jnp.float32) + bout_ref[...]
        o_ref[...] = out.astype(o_ref.dtype)


def residual_mlp_pallas(x, params, *, block_m=128, compute_dtype=jnp.bfloat16):
    """x: (B, input_dim) float32. params: dict of stacked, (in, out)-layout weights."""
    B, input_dim = x.shape
    L, H, _ = params["w1"].shape
    I = params["win"].shape[0]
    O = params["wout"].shape[1]
    assert input_dim == I
    assert L >= 1, "n_hidden_layers == 0 not supported by this kernel"
    # TODO(synk): handle n_hidden_layers == 0 (degenerate 2-layer MLP).

    # Lane-dense (multiple-of-128) feature dims; full sublane-aligned batch tiles.
    Ip, Hp, Op = (_round_up(d, 128) for d in (I, H, O))
    block_m = max(128, _round_up(block_m, 128))
    Bp = _round_up(B, block_m)

    xc = _pad_to(x, (Bp, Ip)).astype(compute_dtype)
    win = _pad_to(params["win"], (Ip, Hp)).astype(compute_dtype)
    bin_ = _pad_to(params["bin"], (1, Hp)).astype(jnp.float32)
    w1 = _pad_to(params["w1"], (L, Hp, Hp)).astype(compute_dtype)
    b1 = _pad_to(params["b1"], (L, 1, Hp)).astype(jnp.float32)
    w2 = _pad_to(params["w2"], (L, Hp, Hp)).astype(compute_dtype)
    b2 = _pad_to(params["b2"], (L, 1, Hp)).astype(jnp.float32)
    wout = _pad_to(params["wout"], (Hp, Op)).astype(compute_dtype)
    bout = _pad_to(params["bout"], (1, Op)).astype(jnp.float32)

    grid = (Bp // block_m, L)

    cd = jnp.dtype(compute_dtype).itemsize
    # VMEM estimate: double-buffered tiles + one layer of weights + f32 carry.
    est = 2 * (block_m * Ip * cd                     # x tile
               + block_m * Op * 4                    # out tile
               + Ip * Hp * cd + Hp * 4               # win / bin
               + 2 * (Hp * Hp * cd + Hp * 4)         # one layer of w1/b1/w2/b2
               + Hp * Op * cd + Op * 4)              # wout / bout
    est += block_m * Hp * 4                          # hidden-state scratch
    vmem_limit = int(min(max(2 * est, 32 * 1024 * 1024), 64 * 1024 * 1024))

    flops = 2 * Bp * (Ip * Hp + 2 * L * Hp * Hp + Hp * Op)
    bytes_accessed = (xc.size * cd + Bp * Op * 4
                      + (win.size + w1.size + w2.size + wout.size) * cd
                      + (bin_.size + b1.size + b2.size + bout.size) * 4)

    in_specs = [
        pl.BlockSpec((block_m, Ip), lambda i, l: (i, 0)),    # x (per batch tile)
        pl.BlockSpec((Ip, Hp), lambda i, l: (0, 0)),         # win (grid-invariant)
        pl.BlockSpec((1, Hp), lambda i, l: (0, 0)),          # bin
        pl.BlockSpec((1, Hp, Hp), lambda i, l: (l, 0, 0)),   # w1 (layer l streamed)
        pl.BlockSpec((1, 1, Hp), lambda i, l: (l, 0, 0)),    # b1
        pl.BlockSpec((1, Hp, Hp), lambda i, l: (l, 0, 0)),   # w2
        pl.BlockSpec((1, 1, Hp), lambda i, l: (l, 0, 0)),    # b2
        pl.BlockSpec((Hp, Op), lambda i, l: (0, 0)),         # wout (grid-invariant)
        pl.BlockSpec((1, Op), lambda i, l: (0, 0)),          # bout
    ]
    out_specs = pl.BlockSpec((block_m, Op), lambda i, l: (i, 0))

    out_padded = pl.pallas_call(
        _residual_mlp_kernel,
        out_shape=jax.ShapeDtypeStruct((Bp, Op), jnp.float32),
        grid=grid,
        in_specs=in_specs,
        out_specs=out_specs,
        scratch_shapes=[pltpu.VMEM((block_m, Hp), jnp.float32)],
        compiler_params=pltpu.CompilerParams(
            dimension_semantics=("parallel", "arbitrary"),
            vmem_limit_bytes=vmem_limit),
        cost_estimate=pl.CostEstimate(flops=flops, transcendentals=0,
                                      bytes_accessed=bytes_accessed),
    )(xc, win, bin_, w1, b1, w2, b2, wout, bout)

    return out_padded[:B, :O]


def init_params(key, input_dim, hidden_dim, n_hidden_layers, output_dim):
    """PyTorch-style uniform +-1/sqrt(fan_in) init; weights stored as (in, out)."""
    def lin(key, fan_in, fan_out):
        kw, kb = jax.random.split(key)
        bound = 1.0 / jnp.sqrt(fan_in)
        w = jax.random.uniform(kw, (fan_in, fan_out), jnp.float32, -bound, bound)
        b = jax.random.uniform(kb, (1, fan_out), jnp.float32, -bound, bound)
        return w, b

    keys = jax.random.split(key, 2 + 2 * n_hidden_layers)
    win, bin_ = lin(keys[0], input_dim, hidden_dim)

    w1s, b1s, w2s, b2s = [], [], [], []
    for l in range(n_hidden_layers):
        w1, b1 = lin(keys[1 + 2 * l], hidden_dim, hidden_dim)
        w2, b2 = lin(keys[2 + 2 * l], hidden_dim, hidden_dim)
        w1s.append(w1); b1s.append(b1); w2s.append(w2); b2s.append(b2)

    wout, bout = lin(keys[-1], hidden_dim, output_dim)

    return {
        "win": win, "bin": bin_,
        "w1": jnp.stack(w1s), "b1": jnp.stack(b1s),
        "w2": jnp.stack(w2s), "b2": jnp.stack(b2s),
        "wout": wout, "bout": bout,
    }


def residual_mlp_ref(x, params):
    """Pure-JAX f32 reference of the PyTorch forward (eval mode)."""
    h = jnp.maximum(x @ params["win"] + params["bin"], 0.0)
    L = params["w1"].shape[0]
    for l in range(L):
        res = h
        t = jnp.maximum(h @ params["w1"][l] + params["b1"][l], 0.0)
        t = t @ params["w2"][l] + params["b2"][l]
        h = t + res
    return h @ params["wout"] + params["bout"]


if __name__ == "__main__":
    input_dim, hidden_dim, n_hidden_layers, output_dim = 16, 32, 2, 8
    batch = 200   # not a multiple of block_m -> exercises the batch-padding path

    key = jax.random.PRNGKey(0)
    kx, kp = jax.random.split(key)
    x = jax.random.normal(kx, (batch, input_dim), jnp.float32)
    params = init_params(kp, input_dim, hidden_dim, n_hidden_layers, output_dim)

    ref = residual_mlp_ref(x, params)

    # f32 compute path: tight numerical check against the reference.
    out_f32 = jax.block_until_ready(
        residual_mlp_pallas(x, params, block_m=128, compute_dtype=jnp.float32))
    assert out_f32.shape == (batch, output_dim)
    assert jnp.allclose(out_f32, ref, atol=1e-4, rtol=1e-4), "f32 mismatch vs reference"

    # bf16 fast path (MXU-friendly, f32 accumulation): looser tolerance.
    out_bf16 = jax.block_until_ready(
        residual_mlp_pallas(x, params, block_m=128, compute_dtype=jnp.bfloat16))
    assert out_bf16.shape == (batch, output_dim)
    assert jnp.allclose(out_bf16, ref, atol=1e-1, rtol=5e-2), "bf16 mismatch vs reference"

    print("KERNEL_OK")
</pallas_src>

<mosaic_0001>
module attributes {stable_mosaic.version = 11 : i64} {
  func.func @_residual_mlp_kernel(%arg0: i32, %arg1: i32, %arg2: memref<128x128xf32, #tpu.memory_space<vmem>>, %arg3: memref<128x128xf32, #tpu.memory_space<vmem>>, %arg4: memref<1x128xf32, #tpu.memory_space<vmem>>, %arg5: memref<1x128x128xf32, #tpu.memory_space<vmem>>, %arg6: memref<1x1x128xf32, #tpu.memory_space<vmem>>, %arg7: memref<1x128x128xf32, #tpu.memory_space<vmem>>, %arg8: memref<1x1x128xf32, #tpu.memory_space<vmem>>, %arg9: memref<128x128xf32, #tpu.memory_space<vmem>>, %arg10: memref<1x128xf32, #tpu.memory_space<vmem>>, %arg11: memref<128x128xf32, #tpu.memory_space<vmem>>, %arg12: memref<128x128xf32, #tpu.memory_space<vmem>>) attributes {dimension_semantics = [#tpu.dimension_semantics<parallel>, #tpu.dimension_semantics<arbitrary>], iteration_bounds = array<i64: 2, 2>, scalar_prefetch = 0 : i64, scratch_operands = 1 : i64, tpu.core_type = #tpu.core_type<tc>, window_params = [{transform_indices = @transform_0, window_bounds = array<i64: 128, 128>}, {pipeline_mode = #tpu.pipeline_mode<synchronous>, transform_indices = @transform_1, window_bounds = array<i64: 128, 128>}, {pipeline_mode = #tpu.pipeline_mode<synchronous>, transform_indices = @transform_2, window_bounds = array<i64: 1, 128>}, {transform_indices = @transform_3, window_bounds = array<i64: 1, 128, 128>}, {transform_indices = @transform_4, window_bounds = array<i64: 1, 1, 128>}, {transform_indices = @transform_5, window_bounds = array<i64: 1, 128, 128>}, {transform_indices = @transform_6, window_bounds = array<i64: 1, 1, 128>}, {pipeline_mode = #tpu.pipeline_mode<synchronous>, transform_indices = @transform_7, window_bounds = array<i64: 128, 128>}, {pipeline_mode = #tpu.pipeline_mode<synchronous>, transform_indices = @transform_8, window_bounds = array<i64: 1, 128>}, {transform_indices = @transform_9, window_bounds = array<i64: 128, 128>}]} {
    %c0_i32 = arith.constant 0 : i32
    %0 = arith.cmpi eq, %arg1, %c0_i32 : i32
    %1 = arith.extui %0 : i1 to i32
    %c0_i32_0 = arith.constant 0 : i32
    %2 = arith.cmpi ne, %1, %c0_i32_0 : i32
    scf.if %2 {
      %c0_19 = arith.constant 0 : index
      %c0_20 = arith.constant 0 : index
      %25 = vector.load %arg2[%c0_19, %c0_20] : memref<128x128xf32, #tpu.memory_space<vmem>>, vector<128x128xf32>
      %c0_21 = arith.constant 0 : index
      %c0_22 = arith.constant 0 : index
      %26 = vector.load %arg3[%c0_21, %c0_22] : memref<128x128xf32, #tpu.memory_space<vmem>>, vector<128x128xf32>
      %cst_23 = arith.constant dense<0.000000e+00> : vector<128x128xf32>
      %27 = tpu.matmul %25, %26, %cst_23 {dimension_numbers = #tpu.dot_dimension_numbers<[1], [0], [0], [1], [0, 0, 1, 1], [], []>} : vector<128x128xf32>, vector<128x128xf32>, vector<128x128xf32> -> vector<128x128xf32>
      %c0_24 = arith.constant 0 : index
      %c0_25 = arith.constant 0 : index
      %28 = vector.load %arg4[%c0_24, %c0_25] : memref<1x128xf32, #tpu.memory_space<vmem>>, vector<1x128xf32>
      %29 = vector.broadcast %28 : vector<1x128xf32> to vector<128x128xf32>
      %30 = arith.addf %27, %29 : vector<128x128xf32>
      %cst_26 = arith.constant 0.000000e+00 : f32
      %31 = vector.broadcast %cst_26 : f32 to vector<128x128xf32>
      %32 = arith.maximumf %30, %31 : vector<128x128xf32>
      %c0_27 = arith.constant 0 : index
      %c0_28 = arith.constant 0 : index
      %33 = vector.load %arg12[%c0_27, %c0_28] : memref<128x128xf32, #tpu.memory_space<vmem>>, vector<128x128xf32>
      tpu.vector_store %arg12[%c0_27, %c0_28], %32 {strides = array<i32>} : memref<128x128xf32, #tpu.memory_space<vmem>>, vector<128x128xf32>,
    } else {
    }
    %c0 = arith.constant 0 : index
    %c0_1 = arith.constant 0 : index
    %3 = vector.load %arg12[%c0, %c0_1] : memref<128x128xf32, #tpu.memory_space<vmem>>, vector<128x128xf32>
    %c0_2 = arith.constant 0 : index
    %c0_3 = arith.constant 0 : index
    %c0_4 = arith.constant 0 : index
    %4 = vector.load %arg5[%c0_2, %c0_3, %c0_4] : memref<1x128x128xf32, #tpu.memory_space<vmem>>, vector<1x128x128xf32>
    %5 = vector.shape_cast %4 : vector<1x128x128xf32> to vector<128x128xf32>
    %cst = arith.constant dense<0.000000e+00> : vector<128x128xf32>
    %6 = tpu.matmul %3, %5, %cst {dimension_numbers = #tpu.dot_dimension_numbers<[1], [0], [0], [1], [0, 0, 1, 1], [], []>} : vector<128x128xf32>, vector<128x128xf32>, vector<128x128xf32> -> vector<128x128xf32>
    %c0_5 = arith.constant 0 : index
    %c0_6 = arith.constant 0 : index
    %c0_7 = arith.constant 0 : index
    %7 = vector.load %arg6[%c0_5, %c0_6, %c0_7] : memref<1x1x128xf32, #tpu.memory_space<vmem>>, vector<1x1x128xf32>
    %8 = vector.shape_cast %7 : vector<1x1x128xf32> to vector<1x128xf32>
    %9 = vector.broadcast %8 : vector<1x128xf32> to vector<128x128xf32>
    %10 = arith.addf %6, %9 : vector<128x128xf32>
    %cst_8 = arith.constant 0.000000e+00 : f32
    %11 = vector.broadcast %cst_8 : f32 to vector<128x128xf32>
    %12 = arith.maximumf %10, %11 : vector<128x128xf32>
    %c0_9 = arith.constant 0 : index
    %c0_10 = arith.constant 0 : index
    %c0_11 = arith.constant 0 : index
    %13 = vector.load %arg7[%c0_9, %c0_10, %c0_11] : memref<1x128x128xf32, #tpu.memory_space<vmem>>, vector<1x128x128xf32>
    %14 = vector.shape_cast %13 : vector<1x128x128xf32> to vector<128x128xf32>
    %cst_12 = arith.constant dense<0.000000e+00> : vector<128x128xf32>
    %15 = tpu.matmul %12, %14, %cst_12 {dimension_numbers = #tpu.dot_dimension_numbers<[1], [0], [0], [1], [0, 0, 1, 1], [], []>} : vector<128x128xf32>, vector<128x128xf32>, vector<128x128xf32> -> vector<128x128xf32>
    %c0_13 = arith.constant 0 : index
    %c0_14 = arith.constant 0 : index
    %c0_15 = arith.constant 0 : index
    %16 = vector.load %arg8[%c0_13, %c0_14, %c0_15] : memref<1x1x128xf32, #tpu.memory_space<vmem>>, vector<1x1x128xf32>
    %17 = vector.shape_cast %16 : vector<1x1x128xf32> to vector<1x128xf32>
    %18 = vector.broadcast %17 : vector<1x128xf32> to vector<128x128xf32>
    %19 = arith.addf %15, %18 : vector<128x128xf32>
    %20 = arith.addf %19, %3 : vector<128x128xf32>
    %c0_16 = arith.constant 0 : index
    %c0_17 = arith.constant 0 : index
    %21 = vector.load %arg12[%c0_16, %c0_17] : memref<128x128xf32, #tpu.memory_space<vmem>>, vector<128x128xf32>
    tpu.vector_store %arg12[%c0_16, %c0_17], %20 {strides = array<i32>} : memref<128x128xf32, #tpu.memory_space<vmem>>, vector<128x128xf32>,
    %c1_i32 = arith.constant 1 : i32
    %22 = arith.cmpi eq, %arg1, %c1_i32 : i32
    %23 = arith.extui %22 : i1 to i32
    %c0_i32_18 = arith.constant 0 : i32
    %24 = arith.cmpi ne, %23, %c0_i32_18 : i32
    scf.if %24 {
      %c0_19 = arith.constant 0 : index
      %c0_20 = arith.constant 0 : index
      %25 = vector.load %arg12[%c0_19, %c0_20] : memref<128x128xf32, #tpu.memory_space<vmem>>, vector<128x128xf32>
      %c0_21 = arith.constant 0 : index
      %c0_22 = arith.constant 0 : index
      %26 = vector.load %arg9[%c0_21, %c0_22] : memref<128x128xf32, #tpu.memory_space<vmem>>, vector<128x128xf32>
      %cst_23 = arith.constant dense<0.000000e+00> : vector<128x128xf32>
      %27 = tpu.matmul %25, %26, %cst_23 {dimension_numbers = #tpu.dot_dimension_numbers<[1], [0], [0], [1], [0, 0, 1, 1], [], []>} : vector<128x128xf32>, vector<128x128xf32>, vector<128x128xf32> -> vector<128x128xf32>
      %c0_24 = arith.constant 0 : index
      %c0_25 = arith.constant 0 : index
      %28 = vector.load %arg10[%c0_24, %c0_25] : memref<1x128xf32, #tpu.memory_space<vmem>>, vector<1x128xf32>
      %29 = vector.broadcast %28 : vector<1x128xf32> to vector<128x128xf32>
      %30 = arith.addf %27, %29 : vector<128x128xf32>
      %c0_26 = arith.constant 0 : index
      %c0_27 = arith.constant 0 : index
      %31 = vector.load %arg11[%c0_26, %c0_27] : memref<128x128xf32, #tpu.memory_space<vmem>>, vector<128x128xf32>
      tpu.vector_store %arg11[%c0_26, %c0_27], %30 {strides = array<i32>} : memref<128x128xf32, #tpu.memory_space<vmem>>, vector<128x128xf32>,
    } else {
    }
    return
  }
  func.func @transform_0(%arg0: i32, %arg1: i32) -> (i32, i32) {
    %c0_i32 = arith.constant 0 : i32
    %c0_i32_0 = arith.constant 0 : i32
    return %arg0, %c0_i32 : i32, i32
  }
  func.func @transform_1(%arg0: i32, %arg1: i32) -> (i32, i32) {
    %c0_i32 = arith.constant 0 : i32
    %c0_i32_0 = arith.constant 0 : i32
    %c0_i32_1 = arith.constant 0 : i32
    return %c0_i32, %c0_i32_0 : i32, i32
  }
  func.func @transform_2(%arg0: i32, %arg1: i32) -> (i32, i32) {
    %c0_i32 = arith.constant 0 : i32
    %c0_i32_0 = arith.constant 0 : i32
    %c0_i32_1 = arith.constant 0 : i32
    return %c0_i32, %c0_i32_0 : i32, i32
  }
  func.func @transform_3(%arg0: i32, %arg1: i32) -> (i32, i32, i32) {
    %c0_i32 = arith.constant 0 : i32
    %c0_i32_0 = arith.constant 0 : i32
    %c0_i32_1 = arith.constant 0 : i32
    return %arg1, %c0_i32, %c0_i32_0 : i32, i32, i32
  }
  func.func @transform_4(%arg0: i32, %arg1: i32) -> (i32, i32, i32) {
    %c0_i32 = arith.constant 0 : i32
    %c0_i32_0 = arith.constant 0 : i32
    %c0_i32_1 = arith.constant 0 : i32
    return %arg1, %c0_i32, %c0_i32_0 : i32, i32, i32
  }
  func.func @transform_5(%arg0: i32, %arg1: i32) -> (i32, i32, i32) {
    %c0_i32 = arith.constant 0 : i32
    %c0_i32_0 = arith.constant 0 : i32
    %c0_i32_1 = arith.constant 0 : i32
    return %arg1, %c0_i32, %c0_i32_0 : i32, i32, i32
  }
  func.func @transform_6(%arg0: i32, %arg1: i32) -> (i32, i32, i32) {
    %c0_i32 = arith.constant 0 : i32
    %c0_i32_0 = arith.constant 0 : i32
    %c0_i32_1 = arith.constant 0 : i32
    return %arg1, %c0_i32, %c0_i32_0 : i32, i32, i32
  }
  func.func @transform_7(%arg0: i32, %arg1: i32) -> (i32, i32) {
    %c0_i32 = arith.constant 0 : i32
    %c0_i32_0 = arith.constant 0 : i32
    %c0_i32_1 = arith.constant 0 : i32
    return %c0_i32, %c0_i32_0 : i32, i32
  }
  func.func @transform_8(%arg0: i32, %arg1: i32) -> (i32, i32) {
    %c0_i32 = arith.constant 0 : i32
    %c0_i32_0 = arith.constant 0 : i32
    %c0_i32_1 = arith.constant 0 : i32
    return %c0_i32, %c0_i32_0 : i32, i32
  }
  func.func @transform_9(%arg0: i32, %arg1: i32) -> (i32, i32) {
    %c0_i32 = arith.constant 0 : i32
    %c0_i32_0 = arith.constant 0 : i32
    return %arg0, %c0_i32 : i32, i32
  }
}

</mosaic_0001>

<bundles_post_ra>
// kernel: tpu_custom_call.1
= control target key start
LH: loop header
LB: loop body
LE: loop exit
PB: predicated region body
PF: predicated region fallthrough
CT: control target
= control target key end

     0   :  { %s2915_s0 = inlined_call_operand.hbm [shape: f32[256,128], index: 0, kind: input, shape index: {}]   ;;  %s2916_s1 = inlined_call_operand.hbm [shape: f32[128,128], index: 1, kind: input, shape index: {}]   ;;  %s2917_s2 = inlined_call_operand.vmem [shape: f32[1,128], index: 2, kind: input, shape index: {}]   ;;  %s2918_s3 = inlined_call_operand.hbm [shape: f32[2,128,128], index: 3, kind: input, shape index: {}]   ;;  %s2919_s4 = inlined_call_operand.vmem [shape: f32[2,1,128], index: 4, kind: input, shape index: {}]   ;;  %s2920_s5 = inlined_call_operand.hbm [shape: f32[2,128,128], index: 5, kind: input, shape index: {}]   ;;  %s2921_s6 = inlined_call_operand.vmem [shape: f32[2,1,128], index: 6, kind: input, shape index: {}]   ;;  %s2922_s7 = inlined_call_operand.hbm [shape: f32[128,128], index: 7, kind: input, shape index: {}]   ;;  %s2923_s8 = inlined_call_operand.vmem [shape: f32[1,128], index: 8, kind: input, shape index: {}]   ;;  %s2924_s9 = inlined_call_operand.hbm [shape: f32[256,128], index: 9, kind: output, shape index: {}]  }
   0x1   :  { %2945 = sst [smem:[#allocation25_spill]] %s2915_s0 }
   0x2   :  { %2946 = sst [smem:[#allocation26_spill]] %s2916_s1 }
   0x3   :  { %2947 = sst [smem:[#allocation27_spill]] %s2917_s2 }
   0x4   :  { %2948 = sst [smem:[#allocation28_spill]] %s2918_s3 }
   0x5   :  { %2949 = sst [smem:[#allocation29_spill]] %s2919_s4 }
   0x6   :  { %2950 = sst [smem:[#allocation30_spill]] %s2921_s6 }
   0x7   :  { %2951 = sst [smem:[#allocation31_spill]] %s2923_s8 }
   0x8   :  { %2952 = sst [smem:[#allocation32_spill]] %s2924_s9 }
   0x9   :  { %14 = vsyncpa [#allocation4], 0 }
   0xa   :  { %16 = vsyncpa [#allocation4 + $0x1], 0 }
   0xb   :  { %17 = vsyncpa [#allocation7], 0 }
   0xc   :  { %18 = vsyncpa [#allocation5], 0 }
   0xd   :  { %20 = vsyncpa [#allocation5 + $0x1], 0  ;;  %s2415_s30 = smov 0   ;;  %s2417_s10 = smov 0  }
   0xe   :  { %s2419_s11 = smov 0   ;;  %s2421_s12 = smov 0  }
   0xf   :  { %s2423_s13 = smov 0   ;;  %s2425_s14 = smov 0  }
  0x10   :  { %s2427_s15 = smov 0   ;;  %s2429_s16 = smov 0  }
  0x11   :  { %s2431_s17 = smov 0   ;;  %s2433_s18 = smov 0  }
  0x12   :  { %s2435_s19 = smov 0  }
  0x13 LB: > { %2953 = sst [smem:[#allocation17_spill]] %s2325_s12  ;;  %p52_p0 = scmp.ne.s32.totalorder %s2333_s14, %s2329_s13  ;;  %s2353_s19 = sphi %s2435_s19, %s26_s19   ;;  %s2349_s18 = sphi %s2433_s18, %s3013_s18   ;;  %s2345_s17 = sphi %s2431_s17, %s3012_s17   ;;  %s2341_s16 = sphi %s2429_s16, %s3011_s16   ;;  %s2337_s15 = sphi %s2427_s15, %s3010_s15   ;;  %s2333_s14 = sphi %s2425_s14, %s3009_s14   ;;  %s2329_s13 = sphi %s2423_s13, %s3008_s13   ;;  %s2325_s12 = sphi %s2421_s12, %s3007_s12   ;;  %s2321_s11 = sphi %s2419_s11, %s3006_s11   ;;  %s2317_s10 = sphi %s2417_s10, %s3005_s10   ;;  %s2313_s30 = sphi %s2415_s30, %s3004_s30  }
  0x14   : > { %2954 = sst [smem:[#allocation18_spill]] %s2337_s15  ;;  %p2932_p1 = scmp.eq.s32.totalorder %s2353_s19, 0 }
  0x15   : > { %2955 = sst [smem:[#allocation19_spill]] %s2341_s16  ;;  %p2926_p3 = scmp.lt.s32.totalorder %s2353_s19, 4 }
  0x16   : > { %p54_p2 = por %p2932_p1, %p52_p0  ;;  %s328_s22 = sand.u32 1, %s2353_s19  }
  0x17   : > { %s330_s23 = sand.u32 1, %s2333_s14   ;;  %s1528_s25 = sshll.u32 %s2349_s18, 11 }
  0x18   : > { %s1501_s24 = sshll.u32 %s330_s23, 7  ;;  %s2956_s0 = sld [smem:[#allocation25_spill]] }
  0x19   : > { %s332_s29 = scalar_lea.vmem [#allocation3], %s1501_s24  ;;  %p2489_p4 = pnand %p2926_p3, %p54_p2 }
  0x1a   : > { %s339_s9 = sshll.u32 %s332_s29, 4  ;;  %s2493_s21 = scalar_lea.sflag [#allocation4], %s328_s22  ;;  %s340_s9 = int_to_ptr.vmem [resolvable:$true] %s339_s9 }
  0x1b   : > { %p2087_p5 = pneg %p2489_p4  ;;  %s2098_s16 = scalar_lea.vmem %s340_s9, 2048 }
  0x1c   : > { %p2099_p6 = scmp.ne.s32.totalorder %s340_s9, %s2098_s16  ;;  %s2355_s23 = smov [#allocation3]  }
  0x1d   : > { %s2103_s26 = sshll.u32 %s2355_s23, 4  ;;  %s2104_s26 = int_to_ptr.vmem [resolvable:$false] %s2103_s26 }
  0x1e   : > { %s338_s28 = scalar_lea.hbm %s2956_s0, %s1528_s25  ;;  %p2101_p7 = pnand %p2099_p6, %p2087_p5 }
  0x1f   : > { %s2105_s24 = scalar_lea.vmem %s2104_s26, 4096  ;;  %p2106_p9 = scmp.lt.s32.totalorder %s340_s9, %s2104_s26 }
  0x20   : > { %p2102_p8 = pneg %p2101_p7  ;;  %p2107_p10 = scmp.lt.s32.totalorder %s2105_s24, %s2098_s16 }
  0x22   : > { %p2108_p11 = por %p2107_p10, %p2106_p9 }
  0x24   : > { %p2109_p12 = pnand %p2108_p11, %p2102_p8 }
  0x26   : > { %2112 = shalt.err (!%p2109_p12)
}
  0x27   : > { %s2927_s25 = smov 128   ;;  %s2929_s22 = smov 8  }
  0x28   : > { %1974 = dma.hbm_to_vmem [thread:$0]  (!%p2489_p4), %s338_s28, 2048, %s340_s9, %s2493_s21, %s2927_s25, %s2927_s25, %s2929_s22  }
  0x29   : > { %s2504_s16 = sadd.s32 4294967295, %s2353_s19   ;;  %s1496_s27 = sadd.s32 4294967294, %s2353_s19  }
  0x2a   : > { %p58_p13 = scmp.ne.s32.totalorder %s2329_s13, %s2325_s12  ;;  %p2931_p2 = scmp.eq.s32.totalorder %s2504_s16, 0 }
  0x2b   : > { %p126_p5 = scmp.ne.s32.totalorder %s2317_s10, %s2313_s30  ;;  %p270_p6 = scmp.eq.s32.totalorder %s2504_s16, 3 }
  0x2c   : > { %p2515_p7 = por %p2931_p2, %p58_p13  ;;  %p276_p4 = scmp.eq.s32.totalorder %s1496_s27, 3 }
  0x2d   : > { %p2521_p8 = por %p126_p5, %p2931_p2  ;;  %p2528_p9 = por %p270_p6, %p52_p0 }
  0x2e   : > { %p2532_p10 = por %p276_p4, %p58_p13  ;;  %p1497_p11 = scmp.ge.s32.totalorder %s2353_s19, 1 }
  0x2f   : > { %s2959_s9 = scalar_select %p2521_p8, 1, 0 }
  0x30   : > { %s2961_s28 = scalar_select %p2528_p9, 1, 0 }
  0x31   : > { %2960 = sst [smem:[#allocation20_spill]] %s2959_s9  ;;  %p283_p12 = scmp.lt.s32.totalorder %s2353_s19, 5 }
  0x32   : > { %2962 = sst [smem:[#allocation21_spill]] %s2961_s28  ;;  %s2358_s23 = smov [#allocation6]  }
  0x33   : > { %s2963_s30 = scalar_select %p2532_p10, 1, 0 }
  0x34   : > { %p2538_p3 = pnand %p1497_p11, %p283_p12  ;;  %s295_s26 = sshll.u32 %s2358_s23, 4  ;;  %s296_s26 = int_to_ptr.vmem [resolvable:$true] %s295_s26 }
  0x35   : > { %2964 = sst [smem:[#allocation22_spill]] %s2963_s30  ;;  %s35_s24 = sadd.s32 1, %s2345_s17 }
  0x36   : > { %p1964_p5 = pneg %p2538_p3  ;;  %p2551_p13 = scmp.ge.s32.totalorder %s35_s24, 2 }
  0x37   : > { %s113_s22 = sadd.s32 1, %s2321_s11  ;;  %p120_p6 = scmp.ne.s32.totalorder %s2321_s11, %s2317_s10 }
  0x38   : > { %p2547_p0 = pnand %p1964_p5, %p2931_p2  ;;  %s351_s0 = sand.u32 1, %s2321_s11  }
  0x39   : > { %s2124_s23 = scalar_lea.vmem %s296_s26, 2048  ;;  %p2132_p2 = scmp.lt.s32.totalorder %s296_s26, %s296_s26 }
  0x3a   : > { %p2942_p4 = pneg %p2547_p0  ;;  %p2125_p11 = scmp.ne.s32.totalorder %s296_s26, %s2124_s23 }
  0x3b   : > { %p2133_p1 = scmp.lt.s32.totalorder %s2124_s23, %s2124_s23 }
  0x3c   : > { %p2127_p12 = pnand %p2125_p11, %p2942_p4 }
  0x3d   : > { %p2134_p10 = por %p2133_p1, %p2132_p2 }
  0x3e   : > { %p2128_p5 = pneg %p2127_p12 }
  0x40   : > { %p2135_p9 = pnand %p2134_p10, %p2128_p5 }
  0x42   : > { %2138 = shalt.err (!%p2135_p9)
}
  0x43   : > { %s2968_s30 = smov 8   ;;  %s2969_s12 = smov 128  }
  0x44   : > { %s2970_s1 = sld [smem:[#allocation26_spill]]  ;;  %s3015_s24 = smov (%p2551_p13, %s35_s24), 0 }
  0x45   : > { %2971 = sst [smem:[#allocation23_spill]] %s3015_s24  ;;  %s2972_s23 = sadd.s32 1, %s2349_s18 }
  0x46   : > { %s3017_s23 = smov (!%p2551_p13, %s2972_s23), %s2349_s18  ;;  %s110_s8 = ssub.s32 %s2345_s17, %s3015_s24 }
  0x47   : > { %p2973_p1 = scmp.eq.s32.totalorder %s2353_s19, 0  ;;  %p40_p9 = scmp.ge.s32.totalorder %s3017_s23, 2 }
  0x48   : > { %p111_p10 = scmp.eq.s32.totalorder %s110_s8, 0  ;;  %s2588_s28 = sshll.u32 %s351_s0, 7 }
  0x49   : > { %p122_p2 = por %p120_p6, %p2973_p1  ;;  %s3019_s23 = smov (%p40_p9, %s3017_s23), 0 }
  0x4a   : > { %1967 = dma.hbm_to_vmem [thread:$0]  (!%p2547_p0), %s2970_s1, 2048, %s296_s26, [#allocation7], %s2969_s12, %s2969_s12, %s2968_s30  }
  0x4b   : > { %s1529_s26 = sshll.u32 %s2345_s17, 11  ;;  %2974 = sst [smem:[#allocation24_spill]] %s3019_s23 }
  0x4c   : > { %s2594_s1 = scalar_select %p111_p10, %s2321_s11, %s113_s22  }
  0x4d   : > { %s42_s25 = ssub.s32 %s2349_s18, %s3019_s23  ;;  %s2975_s3 = sld [smem:[#allocation28_spill]] }
  0x4e   : > { %p43_p11 = scmp.eq.s32.totalorder %s42_s25, 0  ;;  %s353_s4 = scalar_lea.vmem [#allocation8], %s2588_s28 }
  0x4f   : > { %s360_s15 = sshll.u32 %s353_s4, 4  ;;  %p2976_p13 = scmp.lt.s32.totalorder %s2353_s19, 4  ;;  %s361_s15 = int_to_ptr.vmem [resolvable:$true] %s360_s15 }
  0x50   : > { %s2978_s8 = sadd.s32 1, %s2333_s14  ;;  %s2152_s22 = scalar_lea.vmem %s361_s15, 2048 }
  0x51   : > { %p2606_p6 = pnand %p2976_p13, %p122_p2  ;;  %p2153_p5 = scmp.ne.s32.totalorder %s361_s15, %s2152_s22 }
  0x52   : > { %s2613_s9 = scalar_select %p43_p11, %s2333_s14, %s2978_s8  }
  0x53   : > { %s359_s24 = scalar_lea.hbm %s2975_s3, %s1529_s26  ;;  %p2944_p12 = pneg %p2606_p6 }
  0x54   : > { %s2359_s2 = smov [#allocation8]  }
  0x55   : > { %p2155_p1 = pnand %p2153_p5, %p2944_p12  ;;  %s2157_s4 = sshll.u32 %s2359_s2, 4  ;;  %s2158_s4 = int_to_ptr.vmem [resolvable:$false] %s2157_s4 }
  0x56   : > { %s2159_s6 = scalar_lea.vmem %s2158_s4, 4096  ;;  %p2160_p2 = scmp.lt.s32.totalorder %s361_s15, %s2158_s4 }
  0x57   : > { %p2156_p9 = pneg %p2155_p1  ;;  %p2161_p10 = scmp.lt.s32.totalorder %s2159_s6, %s2152_s22 }
  0x59   : > { %p2162_p13 = por %p2161_p10, %p2160_p2 }
  0x5b   : > { %p2163_p4 = pnand %p2162_p13, %p2156_p9 }
  0x5d   : > { %2166 = shalt.err (!%p2163_p4)
}
  0x5e   : > { %1977 = dma.hbm_to_vmem [thread:$0]  (!%p2606_p6), %s359_s24, 2048, %s361_s15, %s2493_s21, %s2969_s12, %s2969_s12, %s2968_s30  }
  0x5f   : > { %s2360_s25 = smov [#allocation10]   ;;  %s2631_s22 = scalar_lea.hbm %s2920_s5, %s1529_s26 }
  0x60   : > { %s311_s8 = sshll.u32 %s2360_s25, 4  ;;  %s380_s4 = scalar_lea.vmem [#allocation9], %s2588_s28  ;;  %s312_s8 = int_to_ptr.vmem [resolvable:$true] %s311_s8 }
  0x61   : > { %s387_s6 = sshll.u32 %s380_s4, 4  ;;  %s2178_s23 = scalar_lea.vmem %s312_s8, 2048  ;;  %s388_s6 = int_to_ptr.vmem [resolvable:$true] %s387_s6 }
  0x62   : > { %p2179_p4 = scmp.ne.s32.totalorder %s312_s8, %s2178_s23  ;;  %p2979_p11 = pneg %p2547_p0 }
  0x63   : > { %p2186_p9 = scmp.lt.s32.totalorder %s312_s8, %s312_s8  ;;  %p2187_p2 = scmp.lt.s32.totalorder %s2178_s23, %s2178_s23 }
  0x64   : > { %p2181_p5 = pnand %p2179_p4, %p2979_p11 }
  0x65   : > { %p2188_p10 = por %p2187_p2, %p2186_p9 }
  0x66   : > { %p2182_p1 = pneg %p2181_p5 }
  0x68   : > { %p2189_p13 = pnand %p2188_p10, %p2182_p1 }
  0x6a   : > { %2192 = shalt.err (!%p2189_p13)
}
  0x6b   : > { %1970 = dma.hbm_to_vmem [thread:$0]  (!%p2547_p0), %s2922_s7, 2048, %s312_s8, [#allocation7], %s2969_s12, %s2969_s12, %s2968_s30  }
  0x6c   : > { %s2206_s24 = scalar_lea.vmem %s388_s6, 2048  ;;  %p2980_p4 = pneg %p2606_p6 }
  0x6d   : > { %p2207_p12 = scmp.ne.s32.totalorder %s388_s6, %s2206_s24  ;;  %s2361_s23 = smov [#allocation9]  }
  0x6e   : > { %s2211_s28 = sshll.u32 %s2361_s23, 4  ;;  %s2212_s28 = int_to_ptr.vmem [resolvable:$false] %s2211_s28 }
  0x6f   : > { %p2209_p11 = pnand %p2207_p12, %p2980_p4  ;;  %s2213_s26 = scalar_lea.vmem %s2212_s28, 4096 }
  0x70   : > { %p2214_p1 = scmp.lt.s32.totalorder %s388_s6, %s2212_s28  ;;  %p2215_p9 = scmp.lt.s32.totalorder %s2213_s26, %s2206_s24 }
  0x71   : > { %p2210_p5 = pneg %p2209_p11 }
  0x72   : > { %p2216_p2 = por %p2215_p9, %p2214_p1 }
  0x74   : > { %p2217_p10 = pnand %p2216_p2, %p2210_p5 }
  0x76   : > { %2220 = shalt.err (!%p2217_p10)
}
  0x77   : > { %1980 = dma.hbm_to_vmem [thread:$0]  (!%p2606_p6), %s2631_s22, 2048, %s388_s6, %s2493_s21, %s2969_s12, %s2969_s12, %s2968_s30  }
  0x78   : > { %405 = sbr.rel (%p2538_p3) target bundleno = 1129 (0x469), region = 56  ;;  %s407_s27 = sand.u32 (!%p2538_p3), 1, %s2504_s16  }
  0x79   : > { %s409_s25 = sand.u32 (!%p2538_p3), 1, %s2329_s13   ;;  %s408_s2 = scalar_lea.sflag (!%p2538_p3), [#allocation4], %s407_s27 }
  0x7a   : > { %s1511_s8 = sshll.u32 (!%p2538_p3), %s409_s25, 7 }
  0x7b   : > { %s2661_s4 = scalar_lea.vmem (!%p2538_p3), [#allocation3], %s1511_s8 }
  0x7d   : > { %2292 = dma.done.wait (%p2515_p7), %s408_s2, 2048  }
  0x7e   : > { %2294 = vsyncadd (%p2515_p7), %s408_s2, 4294965248  ;;  %p2981_p0 = scmp.eq.s32.totalorder %s2504_s16, 0 }
  0x80   : > { %2296 = dma.done.wait (%p2981_p0), [#allocation7], 2048   ;;  %p2982_p3 = pmov %p2981_p0 }
  0x81   : > { %s422_s21 = sand.u32 1, %s2317_s10  }
  0x82   : > { %2298 = vsyncadd (%p2982_p3), [#allocation7], 4294965248  ;;  %s1513_s30 = sshll.u32 %s422_s21, 7 }
  0x83   : > { %s2672_s29 = scalar_lea.vmem [#allocation8], %s1513_s30 }
  0x84   : > { %2300 = dma.done.wait (%p2521_p8), %s408_s2, 4096  }
  0x85   : > { %2302 = vsyncadd (%p2521_p8), %s408_s2, 4294963200  ;;  %s2678_s20 = scalar_lea.vmem [#allocation9], %s1513_s30  ;;  %p2984_p7 = pmov %p2981_p0 }
  0x86   : > { %p2985_p6 = pmov %p2981_p0 }
  0x87   : > { %2304 = dma.done.wait (%p2984_p7), [#allocation7], 2048  }
  0x88   : > { %2306 = vsyncadd (%p2985_p6), [#allocation7], 4294965248  ;;  %s2986_s0 = sld [smem:[#allocation18_spill]]  ;;  %s2696_s2 = scalar_lea.vmem [#allocation11], %s1511_s8 }
  0x89   : > { %s2987_s15 = sld [smem:[#allocation29_spill]] }
  0x8a   : > { %s2988_s26 = sld [smem:[#allocation30_spill]] }
  0x8e   : > { %p489_p12 = scmp.lt.s32.totalorder %s2986_s0, 1  ;;  %p1517_p8 = scmp.ne.s32.totalorder %s2986_s0, 0 }
  0x8f   : > { %s2989_s12 = sld [smem:[#allocation27_spill]] (!%p1517_p8) }
  0x90   : > { %s2686_s22 = scalar_select %p489_p12, %s2986_s0, 1 }
  0x91   : > { %499 = sbr.rel (%p1517_p8) target bundleno = 396 (0x18c), region = 80 }
  0x92   : > { %s491_s24 = scalar_lea.vmem %s2987_s15, %s2686_s22  ;;  %s494_s27 = scalar_lea.vmem %s2988_s26, %s2686_s22 }
  0x96   : > { %v531_v0 = vld [vmem:[#allocation6 + $0x78] sm:$0xff]  ;;  %v530_v1 = vld [vmem:[#allocation6 + $0x70] sm:$0xff]  ;;  %v529_v2 = vld [vmem:[#allocation6 + $0x68] sm:$0xff] }
  0x97   : > { %1660 = vmatprep.subr.mxu0 %v531_v0  ;;  %1884 = vmatprep.subr.mxu1 %v531_v0  ;;  %v528_v3 = vld [vmem:[#allocation6 + $0x60] sm:$0xff]  ;;  %v527_v4 = vld [vmem:[#allocation6 + $0x58] sm:$0xff]  ;;  %v526_v5 = vld [vmem:[#allocation6 + $0x50] sm:$0xff] }
  0x98   : > { %1661 = vmatpush3.msra.mxu0 %v531_v0  ;;  %1900 = vmatpush3.msra.mxu1 %v531_v0  ;;  %v525_v6 = vld [vmem:[#allocation6 + $0x48] sm:$0xff]  ;;  %v524_v7 = vld [vmem:[#allocation6 + $0x40] sm:$0xff]  ;;  %v523_v8 = vld [vmem:[#allocation6 + $0x38] sm:$0xff] }
  0x99   : > { %1662 = vmatprep.subr.mxu0 %v530_v1  ;;  %1885 = vmatprep.subr.mxu1 %v530_v1  ;;  %v522_v9 = vld [vmem:[#allocation6 + $0x30] sm:$0xff]  ;;  %v521_v10 = vld [vmem:[#allocation6 + $0x28] sm:$0xff]  ;;  %v520_v11 = vld [vmem:[#allocation6 + $0x20] sm:$0xff] }
  0x9a   : > { %1663 = vmatpush3.msra.mxu0 %v530_v1  ;;  %1901 = vmatpush3.msra.mxu1 %v530_v1  ;;  %v519_v12 = vld [vmem:[#allocation6 + $0x18] sm:$0xff]  ;;  %v518_v13 = vld [vmem:[#allocation6 + $0x10] sm:$0xff]  ;;  %v517_v14 = vld [vmem:[#allocation6 + $0x8] sm:$0xff] }
  0x9b   : > { %1664 = vmatprep.subr.mxu0 %v529_v2  ;;  %1886 = vmatprep.subr.mxu1 %v529_v2  ;;  %v516_v15 = vld [vmem:[#allocation6] sm:$0xff]  ;;  %v501_v18 = vld [vmem:[%s2661_s4 + $0x8] sm:$0xff]  ;;  %v502_v20 = vld [vmem:[%s2661_s4 + $0x10] sm:$0xff] }
  0x9c   : > { %1665 = vmatpush3.msra.mxu0 %v529_v2  ;;  %1902 = vmatpush3.msra.mxu1 %v529_v2  ;;  %v500_v16 = vld [vmem:[%s2661_s4] sm:$0xff]  ;;  %v509_v19 = vld [vmem:[%s2661_s4 + $0x48] sm:$0xff]  ;;  %v510_v21 = vld [vmem:[%s2661_s4 + $0x50] sm:$0xff] }
  0x9d   : > { %1666 = vmatprep.subr.mxu0 %v528_v3  ;;  %1887 = vmatprep.subr.mxu1 %v528_v3  ;;  %v508_v17 = vld [vmem:[%s2661_s4 + $0x40] sm:$0xff]  ;;  %v503_v22 = vld [vmem:[%s2661_s4 + $0x18] sm:$0xff]  ;;  %v505_v26 = vld [vmem:[%s2661_s4 + $0x28] sm:$0xff] }
  0x9e   : > { %1667 = vmatpush3.msra.mxu0 %v528_v3  ;;  %1903 = vmatpush3.msra.mxu1 %v528_v3  ;;  %v511_v23 = vld [vmem:[%s2661_s4 + $0x58] sm:$0xff]  ;;  %v504_v24 = vld [vmem:[%s2661_s4 + $0x20] sm:$0xff]  ;;  %v513_v27 = vld [vmem:[%s2661_s4 + $0x68] sm:$0xff] }
  0x9f   : > { %1668 = vmatprep.subr.mxu0 %v527_v4  ;;  %1888 = vmatprep.subr.mxu1 %v527_v4  ;;  %v512_v25 = vld [vmem:[%s2661_s4 + $0x60] sm:$0xff]  ;;  %v506_v28 = vld [vmem:[%s2661_s4 + $0x30] sm:$0xff]  ;;  %v507_v30 = vld [vmem:[%s2661_s4 + $0x38] sm:$0xff] }
  0xa0   : > { %1669 = vmatpush3.msra.mxu0 %v527_v4  ;;  %1904 = vmatpush3.msra.mxu1 %v527_v4  ;;  %v514_v29 = vld [vmem:[%s2661_s4 + $0x70] sm:$0xff]  ;;  %v515_v31 = vld [vmem:[%s2661_s4 + $0x78] sm:$0xff]  ;;  %v1518_v32 = vld [vmem:[%s2989_s12] ss:$0 sm:$0xff] }
  0xa1   : > { %1670 = vmatprep.subr.mxu0 %v526_v5  ;;  %1889 = vmatprep.subr.mxu1 %v526_v5 }
  0xa2   : > { %1671 = vmatpush3.msra.mxu0 %v526_v5  ;;  %1905 = vmatpush3.msra.mxu1 %v526_v5 }
  0xa3   : > { %1672 = vmatprep.subr.mxu0 %v525_v6  ;;  %1890 = vmatprep.subr.mxu1 %v525_v6 }
  0xa4   : > { %1673 = vmatpush3.msra.mxu0 %v525_v6  ;;  %1906 = vmatpush3.msra.mxu1 %v525_v6 }
  0xa5   : > { %1674 = vmatprep.subr.mxu0 %v524_v7  ;;  %1891 = vmatprep.subr.mxu1 %v524_v7 }
  0xa6   : > { %1675 = vmatpush3.msra.mxu0 %v524_v7  ;;  %1907 = vmatpush3.msra.mxu1 %v524_v7 }
  0xa7   : > { %1676 = vmatprep.subr.mxu0 %v523_v8  ;;  %1892 = vmatprep.subr.mxu1 %v523_v8 }
  0xa8   : > { %1677 = vmatpush3.msra.mxu0 %v523_v8  ;;  %1908 = vmatpush3.msra.mxu1 %v523_v8 }
  0xa9   : > { %1678 = vmatprep.subr.mxu0 %v522_v9  ;;  %1893 = vmatprep.subr.mxu1 %v522_v9 }
  0xaa   : > { %1679 = vmatpush3.msra.mxu0 %v522_v9  ;;  %1909 = vmatpush3.msra.mxu1 %v522_v9 }
  0xab   : > { %1680 = vmatprep.subr.mxu0 %v521_v10  ;;  %1894 = vmatprep.subr.mxu1 %v521_v10 }
  0xac   : > { %1681 = vmatpush3.msra.mxu0 %v521_v10  ;;  %1910 = vmatpush3.msra.mxu1 %v521_v10 }
  0xad   : > { %1682 = vmatprep.subr.mxu0 %v520_v11  ;;  %1895 = vmatprep.subr.mxu1 %v520_v11 }
  0xae   : > { %1683 = vmatpush3.msra.mxu0 %v520_v11  ;;  %1911 = vmatpush3.msra.mxu1 %v520_v11 }
  0xaf   : > { %1684 = vmatprep.subr.mxu0 %v519_v12  ;;  %1896 = vmatprep.subr.mxu1 %v519_v12 }
  0xb0   : > { %1685 = vmatpush3.msra.mxu0 %v519_v12  ;;  %1912 = vmatpush3.msra.mxu1 %v519_v12 }
  0xb1   : > { %1686 = vmatprep.subr.mxu0 %v518_v13  ;;  %1897 = vmatprep.subr.mxu1 %v518_v13 }
  0xb2   : > { %1687 = vmatpush3.msra.mxu0 %v518_v13  ;;  %1913 = vmatpush3.msra.mxu1 %v518_v13 }
  0xb3   : > { %1688 = vmatprep.subr.mxu0 %v517_v14  ;;  %1898 = vmatprep.subr.mxu1 %v517_v14 }
  0xb4   : > { %1689 = vmatpush3.msra.mxu0 %v517_v14  ;;  %1914 = vmatpush3.msra.mxu1 %v517_v14 }
  0xb5   : > { %1690 = vmatprep.subr.mxu0 %v516_v15  ;;  %1899 = vmatprep.subr.mxu1 %v516_v15 }
  0xb6   : > { %1691 = vmatpush3.msra.mxu0 %v516_v15  ;;  %1915 = vmatpush3.msra.mxu1 %v516_v15 }
  0xb7   : > { %1692 = vmatprep.mubr.f32.mxu0 %v500_v16  ;;  %1704 = vmatprep.mubr.f32.mxu1 %v508_v17 }
  0xb8   : > { %1693 = vmatmul.mubr.f32.vlgmr.msra.gmra.mxu0 %v501_v18  ;;  %1705 = vmatmul.mubr.f32.vlgmr.msra.gmra.mxu1 %v509_v19 }
  0xb9   : > { %1695 = vmatprep.mubr.f32.mxu0 %v502_v20  ;;  %1707 = vmatprep.mubr.f32.mxu1 %v510_v21 }
  0xbc   : > { %1696 = vmatmul.mubr.f32.gmra.mxu0 %v503_v22  ;;  %1708 = vmatmul.mubr.f32.gmra.mxu1 %v511_v23 }
  0xbd   : > { %1698 = vmatprep.mubr.f32.mxu0 %v504_v24  ;;  %1710 = vmatprep.mubr.f32.mxu1 %v512_v25 }
  0xc0   : > { %1699 = vmatmul.mubr.f32.gmra.mxu0 %v505_v26  ;;  %1711 = vmatmul.mubr.f32.gmra.mxu1 %v513_v27 }
  0xc1   : > { %1701 = vmatprep.mubr.f32.mxu0 %v506_v28  ;;  %1713 = vmatprep.mubr.f32.mxu1 %v514_v29 }
  0xc4   : > { %1702 = vmatmul.mubr.f32.gmra.mxu0 %v507_v30  ;;  %1714 = vmatmul.mubr.f32.gmra.mxu1 %v515_v31 }
 0x178   : > { %v1694_v33 = vpop.f32.mrf.mxu0  ;;  %v1706_v34 = vpop.f32.mrf.mxu1 }
 0x179   : > { %v611_v35 = vadd.f32 %v1694_v33, %v1518_v32  ;;  %v651_v36 = vadd.f32 %v1706_v34, %v1518_v32 }
 0x17a   : > { %v605_v37 = vpop.f32.mrf.mxu0  ;;  %v645_v38 = vpop.f32.mrf.mxu1 }
 0x17b   : > { %v685_v39 = vmax.f32 %v611_v35, 0.0  ;;  %v693_v40 = vmax.f32 %v651_v36, 0.0  ;;  %v606_v41 = vadd.f32 %v1518_v32, %v605_v37  ;;  %v646_v42 = vadd.f32 %v1518_v32, %v645_v38 }
 0x17c   : > { %v1697_v43 = vpop.f32.mrf.mxu0  ;;  %v1709_v44 = vpop.f32.mrf.mxu1 }
 0x17d   : > { %701 = vst [vmem:[#allocation2] sm:$0xff] %v685_v39  ;;  %709 = vst [vmem:[#allocation2 + $0x20] sm:$0xff] %v693_v40  ;;  %v684_v45 = vmax.f32 %v606_v41, 0.0  ;;  %v692_v46 = vmax.f32 %v646_v42, 0.0  ;;  %v621_v47 = vadd.f32 %v1697_v43, %v1518_v32  ;;  %v661_v48 = vadd.f32 %v1709_v44, %v1518_v32 }
 0x17e   : > { %v615_v49 = vpop.f32.mrf.mxu0  ;;  %v655_v50 = vpop.f32.mrf.mxu1 }
 0x17f   : > { %700 = vst [vmem:[#allocation2 + $0x30] sm:$0xff] %v684_v45  ;;  %708 = vst [vmem:[#allocation2 + $0x40] sm:$0xff] %v692_v46  ;;  %v687_v51 = vmax.f32 %v621_v47, 0.0  ;;  %v695_v52 = vmax.f32 %v661_v48, 0.0  ;;  %v616_v53 = vadd.f32 %v1518_v32, %v615_v49  ;;  %v656_v54 = vadd.f32 %v1518_v32, %v655_v50 }
 0x180   : > { %v1700_v55 = vpop.f32.mrf.mxu0  ;;  %v1712_v56 = vpop.f32.mrf.mxu1 }
 0x181   : > { %703 = vst [vmem:[#allocation2 + $0x18] sm:$0xff] %v687_v51  ;;  %711 = vst [vmem:[#allocation2 + $0x38] sm:$0xff] %v695_v52  ;;  %v686_v57 = vmax.f32 %v616_v53, 0.0  ;;  %v694_v58 = vmax.f32 %v656_v54, 0.0  ;;  %v631_v59 = vadd.f32 %v1700_v55, %v1518_v32  ;;  %v671_v60 = vadd.f32 %v1712_v56, %v1518_v32 }
 0x182   : > { %v625_v61 = vpop.f32.mrf.mxu0  ;;  %v665_v62 = vpop.f32.mrf.mxu1 }
 0x183   : > { %702 = vst [vmem:[#allocation2 + $0x58] sm:$0xff] %v686_v57  ;;  %710 = vst [vmem:[#allocation2 + $0x10] sm:$0xff] %v694_v58  ;;  %v689_v63 = vmax.f32 %v631_v59, 0.0  ;;  %v697_v0 = vmax.f32 %v671_v60, 0.0  ;;  %v626_v1 = vadd.f32 %v1518_v32, %v625_v61  ;;  %v666_v2 = vadd.f32 %v1518_v32, %v665_v62 }
 0x184   : > { %v1703_v3 = vpop.f32.mrf.mxu0  ;;  %v1715_v4 = vpop.f32.mrf.mxu1 }
 0x185   : > { %705 = vst [vmem:[#allocation2 + $0x68] sm:$0xff] %v689_v63  ;;  %713 = vst [vmem:[#allocation2 + $0x70] sm:$0xff] %v697_v0  ;;  %v688_v5 = vmax.f32 %v626_v1, 0.0  ;;  %v696_v6 = vmax.f32 %v666_v2, 0.0  ;;  %v641_v7 = vadd.f32 %v1703_v3, %v1518_v32  ;;  %v681_v8 = vadd.f32 %v1715_v4, %v1518_v32 }
 0x186   : > { %v635_v9 = vpop.f32.mrf.mxu0  ;;  %v675_v10 = vpop.f32.mrf.mxu1 }
 0x187   : > { %704 = vst [vmem:[#allocation2 + $0x50] sm:$0xff] %v688_v5  ;;  %712 = vst [vmem:[#allocation2 + $0x60] sm:$0xff] %v696_v6  ;;  %v691_v11 = vmax.f32 %v641_v7, 0.0  ;;  %v699_v12 = vmax.f32 %v681_v8, 0.0  ;;  %v636_v13 = vadd.f32 %v1518_v32, %v635_v9  ;;  %v676_v14 = vadd.f32 %v1518_v32, %v675_v10 }
 0x189   : > { %707 = vst [vmem:[#allocation2 + $0x48] sm:$0xff] %v691_v11  ;;  %715 = vst [vmem:[#allocation2 + $0x28] sm:$0xff] %v699_v12  ;;  %v690_v15 = vmax.f32 %v636_v13, 0.0  ;;  %v698_v16 = vmax.f32 %v676_v14, 0.0 }
 0x18b   : > { %706 = vst [vmem:[#allocation2 + $0x8] sm:$0xff] %v690_v15  ;;  %714 = vst [vmem:[#allocation2 + $0x78] sm:$0xff] %v698_v16 }
 0x18c PF: > { %v747_v17 = vld [vmem:[%s2672_s29 + $0x78] sm:$0xff]  ;;  %v746_v18 = vld [vmem:[%s2672_s29 + $0x70] sm:$0xff]  ;;  %v745_v19 = vld [vmem:[%s2672_s29 + $0x68] sm:$0xff]  ;;  %s2992_s22 = sld [smem:[#allocation18_spill]] }
 0x18d   : > { %1716 = vmatprep.subr.mxu0 %v747_v17  ;;  %v744_v20 = vld [vmem:[%s2672_s29 + $0x60] sm:$0xff]  ;;  %v2722_v21 = vld [vmem:[#allocation2 + $0x30] sm:$0xff]  ;;  %v743_v22 = vld [vmem:[%s2672_s29 + $0x58] sm:$0xff] }
 0x18e   : > { %1717 = vmatpush3.msra.mxu0 %v747_v17  ;;  %1748 = vmatprep.mubr.f32.mxu0 %v2722_v21  ;;  %v742_v23 = vld [vmem:[%s2672_s29 + $0x50] sm:$0xff]  ;;  %v741_v24 = vld [vmem:[%s2672_s29 + $0x48] sm:$0xff]  ;;  %v931_v25 = vld [vmem:[%s2678_s20 + $0x78] sm:$0xff] }
 0x18f   : > { %1718 = vmatprep.subr.mxu0 %v746_v18  ;;  %1772 = vmatprep.subr.mxu1 %v931_v25  ;;  %v930_v26 = vld [vmem:[%s2678_s20 + $0x70] sm:$0xff]  ;;  %v740_v27 = vld [vmem:[%s2672_s29 + $0x40] sm:$0xff]  ;;  %v929_v28 = vld [vmem:[%s2678_s20 + $0x68] sm:$0xff] }
 0x190   : > { %1719 = vmatpush3.msra.mxu0 %v746_v18  ;;  %1773 = vmatpush3.msra.mxu1 %v931_v25  ;;  %v739_v29 = vld [vmem:[%s2672_s29 + $0x38] sm:$0xff]  ;;  %v928_v30 = vld [vmem:[%s2678_s20 + $0x60] sm:$0xff]  ;;  %v738_v31 = vld [vmem:[%s2672_s29 + $0x30] sm:$0xff] }
 0x191   : > { %1720 = vmatprep.subr.mxu0 %v745_v19  ;;  %1774 = vmatprep.subr.mxu1 %v930_v26  ;;  %v927_v32 = vld [vmem:[%s2678_s20 + $0x58] sm:$0xff]  ;;  %v737_v33 = vld [vmem:[%s2672_s29 + $0x28] sm:$0xff]  ;;  %v926_v34 = vld [vmem:[%s2678_s20 + $0x50] sm:$0xff] }
 0x192   : > { %1721 = vmatpush3.msra.mxu0 %v745_v19  ;;  %1775 = vmatpush3.msra.mxu1 %v930_v26  ;;  %v736_v35 = vld [vmem:[%s2672_s29 + $0x20] sm:$0xff]  ;;  %v925_v36 = vld [vmem:[%s2678_s20 + $0x48] sm:$0xff]  ;;  %v735_v37 = vld [vmem:[%s2672_s29 + $0x18] sm:$0xff]  ;;  %p1521_p13 = scmp.ne.s32.totalorder %s2992_s22, 1 }
 0x193   : > { %1722 = vmatprep.subr.mxu0 %v744_v20  ;;  %1776 = vmatprep.subr.mxu1 %v929_v28  ;;  %v924_v38 = vld [vmem:[%s2678_s20 + $0x40] sm:$0xff]  ;;  %v734_v39 = vld [vmem:[%s2672_s29 + $0x10] sm:$0xff]  ;;  %v923_v40 = vld [vmem:[%s2678_s20 + $0x38] sm:$0xff]  ;;  %s2993_s15 = sld [smem:[#allocation31_spill]] (!%p1521_p13) }
 0x194   : > { %1723 = vmatpush3.msra.mxu0 %v744_v20  ;;  %1777 = vmatpush3.msra.mxu1 %v929_v28  ;;  %v733_v41 = vld [vmem:[%s2672_s29 + $0x8] sm:$0xff]  ;;  %v922_v42 = vld [vmem:[%s2678_s20 + $0x30] sm:$0xff]  ;;  %v732_v43 = vld [vmem:[%s2672_s29] sm:$0xff] }
 0x195   : > { %1724 = vmatprep.subr.mxu0 %v743_v22  ;;  %1778 = vmatprep.subr.mxu1 %v928_v30  ;;  %v921_v44 = vld [vmem:[%s2678_s20 + $0x28] sm:$0xff]  ;;  %v2748_v45 = vld [vmem:[#allocation2] sm:$0xff]  ;;  %v2751_v47 = vld [vmem:[#allocation2 + $0x58] sm:$0xff] }
 0x196   : > { %1725 = vmatpush3.msra.mxu0 %v743_v22  ;;  %1779 = vmatpush3.msra.mxu1 %v928_v30  ;;  %v920_v46 = vld [vmem:[%s2678_s20 + $0x20] sm:$0xff]  ;;  %v2755_v48 = vld [vmem:[#allocation2 + $0x18] sm:$0xff]  ;;  %v2757_v49 = vld [vmem:[#allocation2 + $0x50] sm:$0xff] }
 0x197   : > { %1726 = vmatprep.subr.mxu0 %v742_v23  ;;  %1780 = vmatprep.subr.mxu1 %v927_v32  ;;  %v2761_v50 = vld [vmem:[#allocation2 + $0x68] sm:$0xff]  ;;  %v2769_v53 = vld [vmem:[#allocation2 + $0x40] sm:$0xff]  ;;  %v2775_v55 = vld [vmem:[#allocation2 + $0x10] sm:$0xff] }
 0x198   : > { %1727 = vmatpush3.msra.mxu0 %v742_v23  ;;  %1781 = vmatpush3.msra.mxu1 %v927_v32  ;;  %v2763_v51 = vld [vmem:[#allocation2 + $0x8] sm:$0xff]  ;;  %v2773_v54 = vld [vmem:[#allocation2 + $0x20] sm:$0xff]  ;;  %v2779_v56 = vld [vmem:[#allocation2 + $0x38] sm:$0xff] }
 0x199   : > { %1728 = vmatprep.subr.mxu0 %v741_v24  ;;  %1782 = vmatprep.subr.mxu1 %v926_v34  ;;  %v2767_v52 = vld [vmem:[#allocation2 + $0x48] sm:$0xff]  ;;  %v2781_v57 = vld [vmem:[#allocation2 + $0x60] sm:$0xff]  ;;  %v2785_v58 = vld [vmem:[#allocation2 + $0x70] sm:$0xff] }
 0x19a   : > { %1729 = vmatpush3.msra.mxu0 %v741_v24  ;;  %1783 = vmatpush3.msra.mxu1 %v926_v34  ;;  %v2787_v59 = vld [vmem:[#allocation2 + $0x78] sm:$0xff]  ;;  %v2791_v60 = vld [vmem:[#allocation2 + $0x28] sm:$0xff]  ;;  %v918_v62 = vld [vmem:[%s2678_s20 + $0x10] sm:$0xff] }
 0x19b   : > { %1730 = vmatprep.subr.mxu0 %v740_v27  ;;  %1784 = vmatprep.subr.mxu1 %v925_v36  ;;  %v919_v61 = vld [vmem:[%s2678_s20 + $0x18] sm:$0xff]  ;;  %v917_v63 = vld [vmem:[%s2678_s20 + $0x8] sm:$0xff]  ;;  %v916_v0 = vld [vmem:[%s2678_s20] sm:$0xff] }
 0x19c   : > { %1731 = vmatpush3.msra.mxu0 %v740_v27  ;;  %1785 = vmatpush3.msra.mxu1 %v925_v36  ;;  %v1519_v1 = vld [vmem:[%s491_s24] ss:$0 sm:$0xff] }
 0x19d   : > { %1732 = vmatprep.subr.mxu0 %v739_v29  ;;  %1786 = vmatprep.subr.mxu1 %v924_v38 }
 0x19e   : > { %1733 = vmatpush3.msra.mxu0 %v739_v29  ;;  %1787 = vmatpush3.msra.mxu1 %v924_v38 }
 0x19f   : > { %1734 = vmatprep.subr.mxu0 %v738_v31  ;;  %1788 = vmatprep.subr.mxu1 %v923_v40 }
 0x1a0   : > { %1735 = vmatpush3.msra.mxu0 %v738_v31  ;;  %1789 = vmatpush3.msra.mxu1 %v923_v40 }
 0x1a1   : > { %1736 = vmatprep.subr.mxu0 %v737_v33  ;;  %1790 = vmatprep.subr.mxu1 %v922_v42 }
 0x1a2   : > { %1737 = vmatpush3.msra.mxu0 %v737_v33  ;;  %1791 = vmatpush3.msra.mxu1 %v922_v42 }
 0x1a3   : > { %1738 = vmatprep.subr.mxu0 %v736_v35  ;;  %1792 = vmatprep.subr.mxu1 %v921_v44 }
 0x1a4   : > { %1739 = vmatpush3.msra.mxu0 %v736_v35  ;;  %1793 = vmatpush3.msra.mxu1 %v921_v44 }
 0x1a5   : > { %1740 = vmatprep.subr.mxu0 %v735_v37  ;;  %1794 = vmatprep.subr.mxu1 %v920_v46 }
 0x1a6   : > { %1741 = vmatpush3.msra.mxu0 %v735_v37  ;;  %1795 = vmatpush3.msra.mxu1 %v920_v46 }
 0x1a7   : > { %1742 = vmatprep.subr.mxu0 %v734_v39  ;;  %1796 = vmatprep.subr.mxu1 %v919_v61 }
 0x1a8   : > { %1743 = vmatpush3.msra.mxu0 %v734_v39  ;;  %1797 = vmatpush3.msra.mxu1 %v919_v61 }
 0x1a9   : > { %1744 = vmatprep.subr.mxu0 %v733_v41  ;;  %1798 = vmatprep.subr.mxu1 %v918_v62 }
 0x1aa   : > { %1745 = vmatpush3.msra.mxu0 %v733_v41  ;;  %1799 = vmatpush3.msra.mxu1 %v918_v62 }
 0x1ab   : > { %1746 = vmatprep.subr.mxu0 %v732_v43  ;;  %1800 = vmatprep.subr.mxu1 %v917_v63 }
 0x1ac   : > { %1747 = vmatpush3.msra.mxu0 %v732_v43  ;;  %1801 = vmatpush3.msra.mxu1 %v917_v63 }
 0x1ad   : > { %1749 = vmatmul.mubr.f32.vlgmr.msra.gmra.mxu0 %v2748_v45  ;;  %1802 = vmatprep.subr.mxu1 %v916_v0 }
 0x1ae   : > { %1751 = vmatprep.mubr.f32.mxu0 %v2751_v47  ;;  %1803 = vmatpush3.msra.mxu1 %v916_v0 }
 0x1b1   : > { %1752 = vmatmul.mubr.f32.gmra.mxu0 %v2755_v48 }
 0x1b2   : > { %1754 = vmatprep.mubr.f32.mxu0 %v2757_v49 }
 0x1b5   : > { %1755 = vmatmul.mubr.f32.gmra.mxu0 %v2761_v50 }
 0x1b6   : > { %1757 = vmatprep.mubr.f32.mxu0 %v2763_v51 }
 0x1b9   : > { %1758 = vmatmul.mubr.f32.gmra.mxu0 %v2767_v52 }
 0x1ba   : > { %1760 = vmatprep.mubr.f32.mxu0 %v2769_v53 }
 0x1bd   : > { %1761 = vmatmul.mubr.f32.gmra.mxu0 %v2773_v54 }
 0x1be   : > { %1763 = vmatprep.mubr.f32.mxu0 %v2775_v55 }
 0x1c1   : > { %1764 = vmatmul.mubr.f32.gmra.mxu0 %v2779_v56 }
 0x1c2   : > { %1766 = vmatprep.mubr.f32.mxu0 %v2781_v57 }
 0x1c5   : > { %1767 = vmatmul.mubr.f32.gmra.mxu0 %v2785_v58 }
 0x1c6   : > { %1769 = vmatprep.mubr.f32.mxu0 %v2787_v59 }
 0x1c9   : > { %1770 = vmatmul.mubr.f32.gmra.mxu0 %v2791_v60 }
 0x26d   : > { %v1750_v2 = vpop.f32.mrf.mxu0 }
 0x26e   : > { %v827_v3 = vadd.f32 %v1750_v2, %v1519_v1 }
 0x26f   : > { %v821_v4 = vpop.f32.mrf.mxu0 }
 0x270   : > { %v822_v5 = vadd.f32 %v1519_v1, %v821_v4  ;;  %v901_v8 = vmax.f32 %v827_v3, 0.0  ;;  %v1520_v3 = vld [vmem:[%s494_s27] ss:$0 sm:$0xff] }
 0x271   : > { %v1753_v6 = vpop.f32.mrf.mxu0 }
 0x272   : > { %v900_v7 = vmax.f32 %v822_v5, 0.0  ;;  %v837_v9 = vadd.f32 %v1753_v6, %v1519_v1 }
 0x273   : > { %v831_v10 = vpop.f32.mrf.mxu0 }
 0x274   : > { %v832_v11 = vadd.f32 %v1519_v1, %v831_v10  ;;  %1804 = vmatprep.mubr.f32.mxu1 %v900_v7  ;;  %v903_v14 = vmax.f32 %v837_v9, 0.0 }
 0x275   : > { %v1756_v12 = vpop.f32.mrf.mxu0  ;;  %1805 = vmatmul.mubr.f32.vlgmr.msra.gmra.mxu1 %v901_v8 }
 0x276   : > { %v902_v13 = vmax.f32 %v832_v11, 0.0  ;;  %v847_v15 = vadd.f32 %v1756_v12, %v1519_v1 }
 0x277   : > { %v841_v16 = vpop.f32.mrf.mxu0 }
 0x278   : > { %v842_v17 = vadd.f32 %v1519_v1, %v841_v16  ;;  %1807 = vmatprep.mubr.f32.mxu1 %v902_v13  ;;  %v905_v20 = vmax.f32 %v847_v15, 0.0 }
 0x279   : > { %v1759_v18 = vpop.f32.mrf.mxu0  ;;  %1808 = vmatmul.mubr.f32.gmra.mxu1 %v903_v14 }
 0x27a   : > { %v904_v19 = vmax.f32 %v842_v17, 0.0  ;;  %v857_v22 = vadd.f32 %v1759_v18, %v1519_v1 }
 0x27b   : > { %v851_v23 = vpop.f32.mrf.mxu0 }
 0x27c   : > { %v852_v24 = vadd.f32 %v1519_v1, %v851_v23  ;;  %1810 = vmatprep.mubr.f32.mxu1 %v904_v19  ;;  %v907_v27 = vmax.f32 %v857_v22, 0.0 }
 0x27d   : > { %v1762_v25 = vpop.f32.mrf.mxu0  ;;  %1811 = vmatmul.mubr.f32.gmra.mxu1 %v905_v20 }
 0x27e   : > { %v906_v26 = vmax.f32 %v852_v24, 0.0  ;;  %v867_v28 = vadd.f32 %v1762_v25, %v1519_v1 }
 0x27f   : > { %v861_v29 = vpop.f32.mrf.mxu0 }
 0x280   : > { %v862_v30 = vadd.f32 %v1519_v1, %v861_v29  ;;  %1813 = vmatprep.mubr.f32.mxu1 %v906_v26  ;;  %v909_v33 = vmax.f32 %v867_v28, 0.0 }
 0x281   : > { %v1765_v31 = vpop.f32.mrf.mxu0  ;;  %1814 = vmatmul.mubr.f32.gmra.mxu1 %v907_v27 }
 0x282   : > { %v908_v32 = vmax.f32 %v862_v30, 0.0  ;;  %v877_v34 = vadd.f32 %v1765_v31, %v1519_v1 }
 0x283   : > { %v871_v35 = vpop.f32.mrf.mxu0 }
 0x284   : > { %v872_v36 = vadd.f32 %v1519_v1, %v871_v35  ;;  %1816 = vmatprep.mubr.f32.mxu1 %v908_v32  ;;  %v911_v39 = vmax.f32 %v877_v34, 0.0 }
 0x285   : > { %v1768_v37 = vpop.f32.mrf.mxu0  ;;  %1817 = vmatmul.mubr.f32.gmra.mxu1 %v909_v33 }
 0x286   : > { %v910_v38 = vmax.f32 %v872_v36, 0.0  ;;  %v887_v40 = vadd.f32 %v1768_v37, %v1519_v1 }
 0x287   : > { %v881_v41 = vpop.f32.mrf.mxu0 }
 0x288   : > { %v882_v42 = vadd.f32 %v1519_v1, %v881_v41  ;;  %1819 = vmatprep.mubr.f32.mxu1 %v910_v38  ;;  %v913_v46 = vmax.f32 %v887_v40, 0.0 }
 0x289   : > { %v1771_v43 = vpop.f32.mrf.mxu0  ;;  %1820 = vmatmul.mubr.f32.gmra.mxu1 %v911_v39 }
 0x28a   : > { %v912_v44 = vmax.f32 %v882_v42, 0.0  ;;  %v897_v61 = vadd.f32 %v1771_v43, %v1519_v1 }
 0x28b   : > { %v891_v62 = vpop.f32.mrf.mxu0 }
 0x28c   : > { %v892_v63 = vadd.f32 %v1519_v1, %v891_v62  ;;  %1822 = vmatprep.mubr.f32.mxu1 %v912_v44  ;;  %v915_v2 = vmax.f32 %v897_v61, 0.0 }
 0x28d   : > { %1823 = vmatmul.mubr.f32.gmra.mxu1 %v913_v46 }
 0x28e   : > { %v914_v0 = vmax.f32 %v892_v63, 0.0 }
 0x290   : > { %1825 = vmatprep.mubr.f32.mxu1 %v914_v0 }
 0x291   : > { %1826 = vmatmul.mubr.f32.gmra.mxu1 %v915_v2 }
 0x335   : > { %v1806_v4 = vpop.f32.mrf.mxu1 }
 0x336   : > { %v1011_v5 = vadd.f32 %v1806_v4, %v1520_v3 }
 0x337   : > { %v1005_v6 = vpop.f32.mrf.mxu1 }
 0x338   : > { %v1085_v7 = vadd.f32 %v1011_v5, %v2748_v45  ;;  %v1006_v8 = vadd.f32 %v1520_v3, %v1005_v6 }
 0x339   : > { %v1809_v9 = vpop.f32.mrf.mxu1 }
 0x33a   : > { %1101 = vst [vmem:[#allocation2] sm:$0xff] %v1085_v7  ;;  %v1084_v1 = vadd.f32 %v1006_v8, %v2722_v21  ;;  %v1021_v10 = vadd.f32 %v1809_v9, %v1520_v3 }
 0x33b   : > { %v1015_v11 = vpop.f32.mrf.mxu1 }
 0x33c   : > { %1100 = vst [vmem:[#allocation2 + $0x30] sm:$0xff] %v1084_v1  ;;  %v1087_v12 = vadd.f32 %v1021_v10, %v2755_v48  ;;  %v1016_v13 = vadd.f32 %v1520_v3, %v1015_v11 }
 0x33d   : > { %v1812_v14 = vpop.f32.mrf.mxu1 }
 0x33e   : > { %1103 = vst [vmem:[#allocation2 + $0x18] sm:$0xff] %v1087_v12  ;;  %v1086_v15 = vadd.f32 %v1016_v13, %v2751_v47  ;;  %v1031_v16 = vadd.f32 %v1812_v14, %v1520_v3 }
 0x33f   : > { %v1025_v17 = vpop.f32.mrf.mxu1 }
 0x340   : > { %1102 = vst [vmem:[#allocation2 + $0x58] sm:$0xff] %v1086_v15  ;;  %v1089_v45 = vadd.f32 %v1031_v16, %v2761_v50  ;;  %v1026_v18 = vadd.f32 %v1520_v3, %v1025_v17 }
 0x341   : > { %v1815_v19 = vpop.f32.mrf.mxu1 }
 0x342   : > { %1105 = vst [vmem:[#allocation2 + $0x68] sm:$0xff] %v1089_v45  ;;  %v1088_v21 = vadd.f32 %v1026_v18, %v2757_v49  ;;  %v1041_v20 = vadd.f32 %v1815_v19, %v1520_v3 }
 0x343   : > { %v1035_v22 = vpop.f32.mrf.mxu1 }
 0x344   : > { %1104 = vst [vmem:[#allocation2 + $0x50] sm:$0xff] %v1088_v21  ;;  %v1091_v48 = vadd.f32 %v1041_v20, %v2767_v52  ;;  %v1036_v23 = vadd.f32 %v1520_v3, %v1035_v22 }
 0x345   : > { %v1818_v24 = vpop.f32.mrf.mxu1 }
 0x346   : > { %1107 = vst [vmem:[#allocation2 + $0x48] sm:$0xff] %v1091_v48  ;;  %v1090_v47 = vadd.f32 %v1036_v23, %v2763_v51  ;;  %v1051_v25 = vadd.f32 %v1818_v24, %v1520_v3 }
 0x347   : > { %v1045_v26 = vpop.f32.mrf.mxu1 }
 0x348   : > { %1106 = vst [vmem:[#allocation2 + $0x8] sm:$0xff] %v1090_v47  ;;  %v1093_v50 = vadd.f32 %v1051_v25, %v2773_v54  ;;  %v1046_v27 = vadd.f32 %v1520_v3, %v1045_v26 }
 0x349   : > { %v1821_v28 = vpop.f32.mrf.mxu1 }
 0x34a   : > { %1109 = vst [vmem:[#allocation2 + $0x20] sm:$0xff] %v1093_v50  ;;  %v1092_v49 = vadd.f32 %v1046_v27, %v2769_v53  ;;  %v1061_v29 = vadd.f32 %v1821_v28, %v1520_v3 }
 0x34b   : > { %v1055_v30 = vpop.f32.mrf.mxu1 }
 0x34c   : > { %1108 = vst [vmem:[#allocation2 + $0x40] sm:$0xff] %v1092_v49  ;;  %v1095_v52 = vadd.f32 %v1061_v29, %v2779_v56  ;;  %v1056_v31 = vadd.f32 %v1520_v3, %v1055_v30 }
 0x34d   : > { %v1824_v32 = vpop.f32.mrf.mxu1 }
 0x34e   : > { %1111 = vst [vmem:[#allocation2 + $0x38] sm:$0xff] %v1095_v52  ;;  %v1094_v51 = vadd.f32 %v1056_v31, %v2775_v55  ;;  %v1071_v33 = vadd.f32 %v1824_v32, %v1520_v3 }
 0x34f   : > { %v1065_v34 = vpop.f32.mrf.mxu1 }
 0x350   : > { %1110 = vst [vmem:[#allocation2 + $0x10] sm:$0xff] %v1094_v51  ;;  %v1097_v54 = vadd.f32 %v1071_v33, %v2785_v58  ;;  %v1066_v35 = vadd.f32 %v1520_v3, %v1065_v34 }
 0x351   : > { %v1827_v36 = vpop.f32.mrf.mxu1 }
 0x352   : > { %1113 = vst [vmem:[#allocation2 + $0x70] sm:$0xff] %v1097_v54  ;;  %v1096_v53 = vadd.f32 %v1066_v35, %v2781_v57  ;;  %v1081_v37 = vadd.f32 %v1827_v36, %v1520_v3 }
 0x353   : > { %v1075_v38 = vpop.f32.mrf.mxu1 }
 0x354   : > { %1112 = vst [vmem:[#allocation2 + $0x60] sm:$0xff] %v1096_v53  ;;  %v1099_v56 = vadd.f32 %v1081_v37, %v2791_v60  ;;  %v1076_v39 = vadd.f32 %v1520_v3, %v1075_v38  ;;  %1119 = sbr.rel (%p1521_p13) target bundleno = 1101 (0x44d), region = 84 }
 0x356   : > { %1115 = vst [vmem:[#allocation2 + $0x28] sm:$0xff] %v1099_v56  ;;  %v1098_v40 = vadd.f32 %v1076_v39, %v2787_v59 }
 0x358   : > { %1114 = vst [vmem:[#allocation2 + $0x78] sm:$0xff] %v1098_v40 }
 0x359   : > { %v1151_v55 = vld [vmem:[#allocation10 + $0x78] sm:$0xff]  ;;  %v1150_v58 = vld [vmem:[#allocation10 + $0x70] sm:$0xff]  ;;  %v1149_v57 = vld [vmem:[#allocation10 + $0x68] sm:$0xff] }
 0x35a   : > { %1828 = vmatprep.subr.mxu0 %v1151_v55  ;;  %1916 = vmatprep.subr.mxu1 %v1151_v55  ;;  %v1148_v60 = vld [vmem:[#allocation10 + $0x60] sm:$0xff]  ;;  %v1147_v59 = vld [vmem:[#allocation10 + $0x58] sm:$0xff]  ;;  %v1146_v41 = vld [vmem:[#allocation10 + $0x50] sm:$0xff] }
 0x35b   : > { %1829 = vmatpush3.msra.mxu0 %v1151_v55  ;;  %1932 = vmatpush3.msra.mxu1 %v1151_v55  ;;  %v1145_v42 = vld [vmem:[#allocation10 + $0x48] sm:$0xff]  ;;  %v1144_v43 = vld [vmem:[#allocation10 + $0x40] sm:$0xff]  ;;  %v1143_v44 = vld [vmem:[#allocation10 + $0x38] sm:$0xff] }
 0x35c   : > { %1830 = vmatprep.subr.mxu0 %v1150_v58  ;;  %1917 = vmatprep.subr.mxu1 %v1150_v58  ;;  %v1142_v46 = vld [vmem:[#allocation10 + $0x30] sm:$0xff]  ;;  %v1141_v61 = vld [vmem:[#allocation10 + $0x28] sm:$0xff]  ;;  %v1140_v62 = vld [vmem:[#allocation10 + $0x20] sm:$0xff] }
 0x35d   : > { %1831 = vmatpush3.msra.mxu0 %v1150_v58  ;;  %1933 = vmatpush3.msra.mxu1 %v1150_v58  ;;  %v1139_v63 = vld [vmem:[#allocation10 + $0x18] sm:$0xff]  ;;  %v1138_v0 = vld [vmem:[#allocation10 + $0x10] sm:$0xff]  ;;  %v1137_v2 = vld [vmem:[#allocation10 + $0x8] sm:$0xff] }
 0x35e   : > { %1832 = vmatprep.subr.mxu0 %v1149_v57  ;;  %1918 = vmatprep.subr.mxu1 %v1149_v57  ;;  %v1136_v3 = vld [vmem:[#allocation10] sm:$0xff]  ;;  %v1120_v4 = vld [vmem:[#allocation2 + $0x30] sm:$0xff]  ;;  %v1122_v8 = vld [vmem:[#allocation2 + $0x58] sm:$0xff] }
 0x35f   : > { %1833 = vmatpush3.msra.mxu0 %v1149_v57  ;;  %1934 = vmatpush3.msra.mxu1 %v1149_v57  ;;  %v1128_v5 = vld [vmem:[#allocation2 + $0x40] sm:$0xff]  ;;  %v1130_v9 = vld [vmem:[#allocation2 + $0x10] sm:$0xff]  ;;  %v1123_v1 = vld [vmem:[#allocation2 + $0x18] sm:$0xff] }
 0x360   : > { %1834 = vmatprep.subr.mxu0 %v1148_v60  ;;  %1919 = vmatprep.subr.mxu1 %v1148_v60  ;;  %v1121_v6 = vld [vmem:[#allocation2] sm:$0xff]  ;;  %v1131_v10 = vld [vmem:[#allocation2 + $0x38] sm:$0xff]  ;;  %v1124_v11 = vld [vmem:[#allocation2 + $0x50] sm:$0xff] }
 0x361   : > { %1835 = vmatpush3.msra.mxu0 %v1148_v60  ;;  %1935 = vmatpush3.msra.mxu1 %v1148_v60  ;;  %v1129_v7 = vld [vmem:[#allocation2 + $0x20] sm:$0xff]  ;;  %v1125_v13 = vld [vmem:[#allocation2 + $0x68] sm:$0xff]  ;;  %v1133_v14 = vld [vmem:[#allocation2 + $0x70] sm:$0xff] }
 0x362   : > { %1836 = vmatprep.subr.mxu0 %v1147_v59  ;;  %1920 = vmatprep.subr.mxu1 %v1147_v59  ;;  %v1132_v12 = vld [vmem:[#allocation2 + $0x60] sm:$0xff]  ;;  %v1126_v15 = vld [vmem:[#allocation2 + $0x8] sm:$0xff]  ;;  %v1134_v16 = vld [vmem:[#allocation2 + $0x78] sm:$0xff] }
 0x363   : > { %1837 = vmatpush3.msra.mxu0 %v1147_v59  ;;  %1936 = vmatpush3.msra.mxu1 %v1147_v59  ;;  %v1127_v17 = vld [vmem:[#allocation2 + $0x48] sm:$0xff]  ;;  %v1522_v18 = vld [vmem:[%s2993_s15] ss:$0 sm:$0xff] }
 0x364   : > { %1838 = vmatprep.subr.mxu0 %v1146_v41  ;;  %1921 = vmatprep.subr.mxu1 %v1146_v41  ;;  %v1135_v45 = vld [vmem:[#allocation2 + $0x28] sm:$0xff] }
 0x365   : > { %1839 = vmatpush3.msra.mxu0 %v1146_v41  ;;  %1937 = vmatpush3.msra.mxu1 %v1146_v41 }
 0x366   : > { %1840 = vmatprep.subr.mxu0 %v1145_v42  ;;  %1922 = vmatprep.subr.mxu1 %v1145_v42 }
 0x367   : > { %1841 = vmatpush3.msra.mxu0 %v1145_v42  ;;  %1938 = vmatpush3.msra.mxu1 %v1145_v42 }
 0x368   : > { %1842 = vmatprep.subr.mxu0 %v1144_v43  ;;  %1923 = vmatprep.subr.mxu1 %v1144_v43 }
 0x369   : > { %1843 = vmatpush3.msra.mxu0 %v1144_v43  ;;  %1939 = vmatpush3.msra.mxu1 %v1144_v43 }
 0x36a   : > { %1844 = vmatprep.subr.mxu0 %v1143_v44  ;;  %1924 = vmatprep.subr.mxu1 %v1143_v44 }
 0x36b   : > { %1845 = vmatpush3.msra.mxu0 %v1143_v44  ;;  %1940 = vmatpush3.msra.mxu1 %v1143_v44 }
 0x36c   : > { %1846 = vmatprep.subr.mxu0 %v1142_v46  ;;  %1925 = vmatprep.subr.mxu1 %v1142_v46 }
 0x36d   : > { %1847 = vmatpush3.msra.mxu0 %v1142_v46  ;;  %1941 = vmatpush3.msra.mxu1 %v1142_v46 }
 0x36e   : > { %1848 = vmatprep.subr.mxu0 %v1141_v61  ;;  %1926 = vmatprep.subr.mxu1 %v1141_v61 }
 0x36f   : > { %1849 = vmatpush3.msra.mxu0 %v1141_v61  ;;  %1942 = vmatpush3.msra.mxu1 %v1141_v61 }
 0x370   : > { %1850 = vmatprep.subr.mxu0 %v1140_v62  ;;  %1927 = vmatprep.subr.mxu1 %v1140_v62 }
 0x371   : > { %1851 = vmatpush3.msra.mxu0 %v1140_v62  ;;  %1943 = vmatpush3.msra.mxu1 %v1140_v62 }
 0x372   : > { %1852 = vmatprep.subr.mxu0 %v1139_v63  ;;  %1928 = vmatprep.subr.mxu1 %v1139_v63 }
 0x373   : > { %1853 = vmatpush3.msra.mxu0 %v1139_v63  ;;  %1944 = vmatpush3.msra.mxu1 %v1139_v63 }
 0x374   : > { %1854 = vmatprep.subr.mxu0 %v1138_v0  ;;  %1929 = vmatprep.subr.mxu1 %v1138_v0 }
 0x375   : > { %1855 = vmatpush3.msra.mxu0 %v1138_v0  ;;  %1945 = vmatpush3.msra.mxu1 %v1138_v0 }
 0x376   : > { %1856 = vmatprep.subr.mxu0 %v1137_v2  ;;  %1930 = vmatprep.subr.mxu1 %v1137_v2 }
 0x377   : > { %1857 = vmatpush3.msra.mxu0 %v1137_v2  ;;  %1946 = vmatpush3.msra.mxu1 %v1137_v2 }
 0x378   : > { %1858 = vmatprep.subr.mxu0 %v1136_v3  ;;  %1931 = vmatprep.subr.mxu1 %v1136_v3 }
 0x379   : > { %1859 = vmatpush3.msra.mxu0 %v1136_v3  ;;  %1947 = vmatpush3.msra.mxu1 %v1136_v3 }
 0x37a   : > { %1860 = vmatprep.mubr.f32.mxu0 %v1120_v4  ;;  %1872 = vmatprep.mubr.f32.mxu1 %v1128_v5 }
 0x37b   : > { %1861 = vmatmul.mubr.f32.vlgmr.msra.gmra.mxu0 %v1121_v6  ;;  %1873 = vmatmul.mubr.f32.vlgmr.msra.gmra.mxu1 %v1129_v7 }
 0x37c   : > { %1863 = vmatprep.mubr.f32.mxu0 %v1122_v8  ;;  %1875 = vmatprep.mubr.f32.mxu1 %v1130_v9 }
 0x37f   : > { %1864 = vmatmul.mubr.f32.gmra.mxu0 %v1123_v1  ;;  %1876 = vmatmul.mubr.f32.gmra.mxu1 %v1131_v10 }
 0x380   : > { %1866 = vmatprep.mubr.f32.mxu0 %v1124_v11  ;;  %1878 = vmatprep.mubr.f32.mxu1 %v1132_v12 }
 0x383   : > { %1867 = vmatmul.mubr.f32.gmra.mxu0 %v1125_v13  ;;  %1879 = vmatmul.mubr.f32.gmra.mxu1 %v1133_v14 }
 0x384   : > { %1869 = vmatprep.mubr.f32.mxu0 %v1126_v15  ;;  %1881 = vmatprep.mubr.f32.mxu1 %v1134_v16 }
 0x387   : > { %1870 = vmatmul.mubr.f32.gmra.mxu0 %v1127_v17  ;;  %1882 = vmatmul.mubr.f32.gmra.mxu1 %v1135_v45 }
 0x43b   : > { %v1862_v19 = vpop.f32.mrf.mxu0  ;;  %v1874_v21 = vpop.f32.mrf.mxu1 }
 0x43c   : > { %v1231_v20 = vadd.f32 %v1862_v19, %v1522_v18  ;;  %v1271_v22 = vadd.f32 %v1874_v21, %v1522_v18 }
 0x43d   : > { %v1225_v48 = vpop.f32.mrf.mxu0  ;;  %v1265_v23 = vpop.f32.mrf.mxu1 }
 0x43e   : > { %1305 = vst [vmem:[%s2696_s2 + $0x8] sm:$0xff] %v1231_v20  ;;  %1313 = vst [vmem:[%s2696_s2 + $0x48] sm:$0xff] %v1271_v22  ;;  %v1226_v24 = vadd.f32 %v1522_v18, %v1225_v48  ;;  %v1266_v47 = vadd.f32 %v1522_v18, %v1265_v23 }
 0x43f   : > { %v1865_v25 = vpop.f32.mrf.mxu0  ;;  %v1877_v26 = vpop.f32.mrf.mxu1 }
 0x440   : > { %1304 = vst [vmem:[%s2696_s2] sm:$0xff] %v1226_v24  ;;  %1312 = vst [vmem:[%s2696_s2 + $0x40] sm:$0xff] %v1266_v47  ;;  %v1241_v50 = vadd.f32 %v1865_v25, %v1522_v18  ;;  %v1281_v27 = vadd.f32 %v1877_v26, %v1522_v18 }
 0x441   : > { %v1235_v28 = vpop.f32.mrf.mxu0  ;;  %v1275_v49 = vpop.f32.mrf.mxu1 }
 0x442   : > { %1307 = vst [vmem:[%s2696_s2 + $0x18] sm:$0xff] %v1241_v50  ;;  %1315 = vst [vmem:[%s2696_s2 + $0x58] sm:$0xff] %v1281_v27  ;;  %v1236_v29 = vadd.f32 %v1522_v18, %v1235_v28  ;;  %v1276_v30 = vadd.f32 %v1522_v18, %v1275_v49 }
 0x443   : > { %v1868_v52 = vpop.f32.mrf.mxu0  ;;  %v1880_v31 = vpop.f32.mrf.mxu1 }
 0x444   : > { %1306 = vst [vmem:[%s2696_s2 + $0x10] sm:$0xff] %v1236_v29  ;;  %1314 = vst [vmem:[%s2696_s2 + $0x50] sm:$0xff] %v1276_v30  ;;  %v1251_v32 = vadd.f32 %v1868_v52, %v1522_v18  ;;  %v1291_v51 = vadd.f32 %v1880_v31, %v1522_v18 }
 0x445   : > { %v1245_v33 = vpop.f32.mrf.mxu0  ;;  %v1285_v34 = vpop.f32.mrf.mxu1 }
 0x446   : > { %1309 = vst [vmem:[%s2696_s2 + $0x28] sm:$0xff] %v1251_v32  ;;  %1317 = vst [vmem:[%s2696_s2 + $0x68] sm:$0xff] %v1291_v51  ;;  %v1246_v54 = vadd.f32 %v1522_v18, %v1245_v33  ;;  %v1286_v35 = vadd.f32 %v1522_v18, %v1285_v34 }
 0x447   : > { %v1871_v36 = vpop.f32.mrf.mxu0  ;;  %v1883_v53 = vpop.f32.mrf.mxu1 }
 0x448   : > { %1308 = vst [vmem:[%s2696_s2 + $0x20] sm:$0xff] %v1246_v54  ;;  %1316 = vst [vmem:[%s2696_s2 + $0x60] sm:$0xff] %v1286_v35  ;;  %v1261_v37 = vadd.f32 %v1871_v36, %v1522_v18  ;;  %v1301_v38 = vadd.f32 %v1883_v53, %v1522_v18 }
 0x449   : > { %v1255_v56 = vpop.f32.mrf.mxu0  ;;  %v1295_v39 = vpop.f32.mrf.mxu1 }
 0x44a   : > { %1311 = vst [vmem:[%s2696_s2 + $0x38] sm:$0xff] %v1261_v37  ;;  %1319 = vst [vmem:[%s2696_s2 + $0x78] sm:$0xff] %v1301_v38  ;;  %v1256_v40 = vadd.f32 %v1522_v18, %v1255_v56  ;;  %v1296_v55 = vadd.f32 %v1522_v18, %v1295_v39 }
 0x44c   : > { %1310 = vst [vmem:[%s2696_s2 + $0x30] sm:$0xff] %v1256_v40  ;;  %1318 = vst [vmem:[%s2696_s2 + $0x70] sm:$0xff] %v1296_v55 }
 0x44d PF: > { %s2994_s24 = sld [smem:[#allocation19_spill]]  ;;  %s1334_s4 = sshll.u32 %s2696_s2, 4  ;;  %s2851_s4 = int_to_ptr.vmem [resolvable:$true] %s1334_s4 }
 0x44e   : > { %s2995_s23 = sld [smem:[#allocation21_spill]]  ;;  %s2855_s21 = scalar_lea.sflag [#allocation5], %s409_s25 }
 0x44f   : > { %s2996_s16 = sld [smem:[#allocation32_spill]]  ;;  %s2221_s30 = scalar_lea.vmem %s2851_s4, 2048 }
 0x450   : > { %p2222_p4 = scmp.ne.s32.totalorder %s2851_s4, %s2221_s30  ;;  %s2362_s29 = smov [#allocation11]  }
 0x451   : > { %s2225_s20 = sshll.u32 %s2362_s29, 4  ;;  %s2226_s20 = int_to_ptr.vmem [resolvable:$false] %s2225_s20 }
 0x452   : > { %s2227_s0 = scalar_lea.vmem %s2226_s20, 4096  ;;  %p2228_p9 = scmp.lt.s32.totalorder %s2851_s4, %s2226_s20 }
 0x453   : > { %s1531_s28 = sshll.u32 %s2994_s24, 11  ;;  %p2229_p2 = scmp.lt.s32.totalorder %s2227_s0, %s2221_s30 }
 0x454   : > { %p2998_p11 = scmp.ne.s32.totalorder %s2995_s23, 0 }
 0x455   : > { %s2997_s8 = smov %s2996_s16  ;;  %s2848_s12 = scalar_lea.hbm %s2996_s16, %s1531_s28 }
 0x456   : > { %p2223_p5 = pnand %p2222_p4, %p2998_p11  ;;  %p2230_p10 = por %p2229_p2, %p2228_p9 }
 0x458   : > { %p2224_p1 = pneg %p2223_p5 }
 0x45a   : > { %p2231_p0 = pnand %p2230_p10, %p2224_p1 }
 0x45c   : > { %2234 = shalt.err (!%p2231_p0)
}
 0x45d   : > { %s2235_s25 = scalar_lea.hbm %s2848_s12, 2048  ;;  %s2239_s6 = scalar_lea.hbm %s2997_s8, 4096 }
 0x45e   : > { %p2236_p3 = scmp.ne.s32.totalorder %s2848_s12, %s2235_s25  ;;  %p2240_p12 = scmp.lt.s32.totalorder %s2848_s12, %s2997_s8 }
 0x45f   : > { %p2241_p8 = scmp.lt.s32.totalorder %s2239_s6, %s2235_s25 }
 0x460   : > { %p2237_p7 = pnand %p2236_p3, %p2998_p11 }
 0x461   : > { %p2242_p13 = por %p2241_p8, %p2240_p12 }
 0x462   : > { %p2238_p6 = pneg %p2237_p7 }
 0x464   : > { %p2243_p4 = pnand %p2242_p13, %p2238_p6 }
 0x466   : > { %2246 = shalt.err (!%p2243_p4)
}
 0x467   : > { %s2363_s24 = smov 128   ;;  %s2364_s28 = smov 8  }
 0x468   : > { %1962 = dma.vmem_to_hbm [thread:$0]  (%p2998_p11), %s2851_s4, 2048, %s2848_s12, %s2855_s21, %s2363_s24, %s2363_s24, %s2364_s28  }
 0x469 PF: > { %s2999_s26 = sld [smem:[#allocation17_spill]]  ;;  %p1990_p5 = scmp.ge.s32.totalorder %s2353_s19, 2 }
 0x46a   : > { %s3000_s27 = sld [smem:[#allocation22_spill]] }
 0x46f   : > { %s1349_s16 = sand.u32 1, %s2999_s26  }
 0x470   : > { %p3001_p1 = scmp.ne.s32.totalorder %s3000_s27, 0  ;;  %s1350_s30 = scalar_lea.sflag [#allocation5], %s1349_s16 }
 0x472   : > { %p1982_p9 = pnand %p1990_p5, %p3001_p1 }
 0x474   : > { %p1983_p2 = pneg %p1982_p9 }
 0x476   : > { %2308 = dma.done.wait (%p1983_p2), %s1350_s30, 2048  }
 0x477   : > { %2310 = vsyncadd (%p1983_p2), %s1350_s30, 4294965248  ;;  %s26_s19 = sadd.s32 1, %s2353_s19   ;;  %s3002_s23 = sld [smem:[#allocation23_spill]] }
 0x478   : > { %p23_p10 = scmp.ge.s32.totalorder %s26_s19, 6   ;;  %s3003_s4 = sld [smem:[#allocation24_spill]] }
 0x479   : > { %s3004_s30 = smov %s2317_s10  ;;  %s3005_s10 = smov %s2321_s11 }
 0x47a   : > { %s3006_s11 = smov %s2594_s1  ;;  %s3007_s12 = smov %s2329_s13 }
 0x47b   : > { %s3008_s13 = smov %s2333_s14  ;;  %s3009_s14 = smov %s2613_s9 }
 0x47c   : > { %s3010_s15 = smov %s2345_s17  ;;  %s3011_s16 = smov %s2349_s18 }
 0x47d   : > { %s3012_s17 = smov %s3002_s23  ;;  %25 = sbr.rel (!%p23_p10) target bundleno = 19 (0x13), region = 145 }
 0x47e   : > { %s3013_s18 = smov %s3003_s4 }
 0x482   :  { %1355 = vsyncpa [#allocation4], 1 }
 0x483   :  { %1357 = vsyncpa [#allocation4 + $0x1], 1 }
 0x484   :  { %1358 = vsyncpa [#allocation7], 1 }
 0x485   :  { %1359 = vsyncpa [#allocation5], 1 }
 0x486   :  { %1361 = vsyncpa [#allocation5 + $0x1], 1 }

</bundles_post_ra>
